<compile_context>
chip_gen: v7x
topology: tpu7x:2x2x1
jax: 0.10.0
libtpu: 0.0.40
codegen_flags: <defaults>
</compile_context>

<pallas_src>
import math
import functools
from typing import NamedTuple

import jax
import jax.numpy as jnp
from jax.experimental import pallas as pl
from jax.experimental.pallas import tpu as pltpu


# ----------------------------------------------------------------------------
# __init__-time parameter construction (plain JAX glue, mirrors the torch code)
# ----------------------------------------------------------------------------

A_INV = jnp.array(
    [[1, 0, 0, 0, 0, 0, 0, 0, 0, 0, 0, 0, 0, 0, 0, 0],
     [0, 0, 0, 0, 1, 0, 0, 0, 0, 0, 0, 0, 0, 0, 0, 0],
     [-3, 3, 0, 0, -2, -1, 0, 0, 0, 0, 0, 0, 0, 0, 0, 0],
     [2, -2, 0, 0, 1, 1, 0, 0, 0, 0, 0, 0, 0, 0, 0, 0],
     [0, 0, 0, 0, 0, 0, 0, 0, 1, 0, 0, 0, 0, 0, 0, 0],
     [0, 0, 0, 0, 0, 0, 0, 0, 0, 0, 0, 0, 1, 0, 0, 0],
     [0, 0, 0, 0, 0, 0, 0, 0, -3, 3, 0, 0, -2, -1, 0, 0],
     [0, 0, 0, 0, 0, 0, 0, 0, 2, -2, 0, 0, 1, 1, 0, 0],
     [-3, 0, 3, 0, 0, 0, 0, 0, -2, 0, -1, 0, 0, 0, 0, 0],
     [0, 0, 0, 0, -3, 0, 3, 0, 0, 0, 0, 0, -2, 0, -1, 0],
     [9, -9, -9, 9, 6, 3, -6, -3, 6, -6, 3, -3, 4, 2, 2, 1],
     [-6, 6, 6, -6, -3, -3, 3, 3, -4, 4, -2, 2, -2, -2, -1, -1],
     [2, 0, -2, 0, 0, 0, 0, 0, 1, 0, 1, 0, 0, 0, 0, 0],
     [0, 0, 0, 0, 2, 0, -2, 0, 0, 0, 0, 0, 1, 0, 1, 0],
     [-6, 6, 6, -6, -4, -2, 4, 2, -3, 3, -3, 3, -2, -1, -2, -1],
     [4, -4, -4, 4, 2, 2, -2, -2, 2, -2, 2, -2, 1, 1, 1, 1]],
    dtype=jnp.float32)


def pad_warp(x):
    # torch pad_warp == periodic (wrap) padding of 1 on H and W
    return jnp.pad(x, ((1, 1), (1, 1), (0, 0)), mode="wrap")


def Nx(x):
    # conv with [[0,0,0],[-0.5,0,0.5],[0,0,0]] on wrap-padded x
    return 0.5 * (jnp.roll(x, -1, axis=1) - jnp.roll(x, 1, axis=1))


def Ny(x):
    # conv with the transposed kernel on wrap-padded x
    return 0.5 * (jnp.roll(x, -1, axis=0) - jnp.roll(x, 1, axis=0))


def Nxy(x):
    k = [[0.5, -0.5, 0.0], [-0.5, 1.0, -0.5], [0.0, -0.5, 0.5]]
    out = jnp.zeros_like(x)
    for dh in range(3):
        for dw in range(3):
            w = k[dh][dw]
            if w != 0.0:
                out = out + w * jnp.roll(jnp.roll(x, 1 - dh, axis=0), 1 - dw, axis=1)
    return out


def bicubic_coeff(normal):
    H, W, C = normal.shape
    n = pad_warp(normal)
    nx = pad_warp(Nx(normal))
    ny = pad_warp(Ny(normal))
    nxy = pad_warp(Nxy(normal))

    def four(a):
        return [a[1:-1, 1:-1], a[1:-1, 2:], a[2:, 1:-1], a[2:, 2:]]

    x = jnp.stack(four(n) + four(nx) + four(ny) + four(nxy), axis=-1)  # (H,W,C,16)
    coeff = jnp.einsum("ij,hwcj->hwci", A_INV, x)
    return coeff.reshape(H, W, C, 4, 4)


def _pack_coeff_table(normal_coeff):
    """(H,W,2,4,4) f32 -> (64, H*W) bf16 slab: rows 0:32 hi, 32:64 lo.

    Row ordering within each half is  row = j*8 + i*2 + c  so the in-kernel
    bicubic evaluation can run Horner on (8, B) sublane slabs (over j) and
    (2, B) slices (over i).  Column = h*W + w.
    """
    H, W, C, _, _ = normal_coeff.shape
    coeff_t = jnp.transpose(normal_coeff.astype(jnp.float32),
                            (4, 3, 2, 0, 1)).reshape(C * 16, H * W)
    c_hi = coeff_t.astype(jnp.bfloat16)
    c_lo = (coeff_t - c_hi.astype(jnp.float32)).astype(jnp.bfloat16)
    return jnp.concatenate([c_hi, c_lo], axis=0)                 # (2*C*16, HW)


class PositionNormalState(NamedTuple):
    table: jnp.ndarray          # (64, H*W) bf16 packed hi/lo coefficient table
    normal_coeff: jnp.ndarray   # (H, W, 2, 4, 4) f32 (kept for reference check)
    H: int
    W: int
    nmin: jnp.ndarray
    nmax: jnp.ndarray
    sigma_r_min: float


def build_position_normal(normal, sigma_r_min=0.003):
    """Mirrors PositionNormal.__init__; also pre-packs the kernel's table."""
    if normal.shape[-1] == 1:
        nx = Nx(normal)
        ny = Ny(normal)
        nz = jnp.sqrt(jnp.maximum(1.0 - nx * nx - ny * ny, 0.0))
        n3 = jnp.concatenate([nx, ny, nz], axis=-1)
        n3 = n3 / jnp.maximum(jnp.linalg.norm(n3, axis=-1, keepdims=True), 1e-12)
        normal = n3
    normal = normal[..., :2]
    nmin = jnp.min(normal - 3 * sigma_r_min)
    nmax = jnp.max(normal + 3 * sigma_r_min)
    normal_coeff = bicubic_coeff(normal)[:, :, :2]               # (H, W, 2, 4, 4)
    H, W = normal_coeff.shape[0], normal_coeff.shape[1]
    table = _pack_coeff_table(normal_coeff)                      # hoisted to init
    return PositionNormalState(table=table, normal_coeff=normal_coeff,
                               H=H, W=W, nmin=nmin, nmax=nmax,
                               sigma_r_min=float(sigma_r_min))


# ----------------------------------------------------------------------------
# Pallas kernel: forward()  ==  getN(coeff, u*0.5+0.5) -> Gaussian NDF vs s
# ----------------------------------------------------------------------------

def _ndf_kernel(tbl_ref, q_ref, out_ref, *, H, W, sigma_r):
    """All kernel arrays are lane-dense: batch B lives on the last (lane) dim.

    tbl_ref: (64, H*W) bf16.  Rows 0:32 = hi half, 32:64 = lo half of the f32
             coefficient table; within each half row = j*8 + i*2 + c, and
             column = h*W + w.
    q_ref:   (4, B) f32.  Rows 0:2 = query positions u (in [-1,1]),
             rows 2:4 = query normals s.
    out_ref: (1, B) f32 NDF values.
    """
    HW = tbl_ref.shape[1]
    B = q_ref.shape[1]
    CK = tbl_ref.shape[0] // 2        # 32 = C*16

    q = q_ref[...]                                       # (4, B)
    uv = q[0:2, :] * 0.5 + 0.5                           # (2, B) in [0, 1]
    v = uv[0:1, :] * H                                   # (torch: v = uv[...,0]*H)
    u = uv[1:2, :] * W                                   # (torch: u = uv[...,1]*W)
    u0f = jnp.floor(u)
    v0f = jnp.floor(v)
    uf = u - u0f                                         # fractional parts (1, B)
    vf = v - v0f
    # NOTE: keeps the original module's axis quirk (u0 % H, v0 % W); it is
    # only meaningful for square maps, exactly as in the torch reference.
    u0 = jnp.mod(u0f.astype(jnp.int32), H)
    v0 = jnp.mod(v0f.astype(jnp.int32), W)
    idx = u0 * W + v0                                    # (1, B) flat spatial index

    # --- MXU gather: table (64, HW) @ onehot (HW, B) -> (64, B) -------------
    # One fused pass gathers both bf16 halves; hi+lo reconstructs ~f32.
    rows = jax.lax.broadcasted_iota(jnp.int32, (HW, B), 0)
    onehot = (rows == idx).astype(jnp.bfloat16)          # exact 0/1, no f32 select
    g2 = jnp.dot(tbl_ref[...], onehot, preferred_element_type=jnp.float32)
    g = g2[0:CK, :] + g2[CK:2 * CK, :]                   # (32, B), row = j*8+i*2+c

    # --- bicubic evaluation: slab-wise Horner (VPU, full sublane slabs) -----
    a0 = g[0:8, :]                                       # j = 0 slab, (8, B)
    a1 = g[8:16, :]                                      # j = 1
    a2 = g[16:24, :]                                     # j = 2
    a3 = g[24:32, :]                                     # j = 3
    t = ((a3 * vf + a2) * vf + a1) * vf + a0             # (8, B): row = i*2 + c
    n = ((t[6:8, :] * uf + t[4:6, :]) * uf + t[2:4, :]) * uf + t[0:2, :]   # (2, B)

    inv_s = 1.0 / sigma_r
    d = (n - q[2:4, :]) * inv_s                          # (2, B)
    out_ref[...] = (1.0 / (2.0 * math.pi * sigma_r)) * jnp.exp(
        -0.5 * (d[0:1, :] * d[0:1, :] + d[1:2, :] * d[1:2, :]))


def _cdiv(a, b):
    return -(-a // b)


def _round_up(a, b):
    return _cdiv(a, b) * b


def _make_forward_call(*, n_rows, HW, block_b, n_blocks, B_pad, H, W, sigma_r,
                       single_buffer_table):
    if single_buffer_table:
        # Constant index_map -> fetched once; single buffer halves residency.
        table_spec = pl.BlockSpec((n_rows, HW), lambda i: (0, 0),
                                  pipeline_mode=pl.Buffered(1))
    else:
        table_spec = pl.BlockSpec((n_rows, HW), lambda i: (0, 0))
    kernel = functools.partial(_ndf_kernel, H=H, W=W, sigma_r=sigma_r)
    return pl.pallas_call(
        kernel,
        out_shape=jax.ShapeDtypeStruct((1, B_pad), jnp.float32),
        grid_spec=pltpu.PrefetchScalarGridSpec(
            num_scalar_prefetch=0,
            grid=(n_blocks,),
            in_specs=[
                table_spec,                                   # resident table
                pl.BlockSpec((4, block_b), lambda i: (0, i)),  # merged u|s queries
            ],
            out_specs=pl.BlockSpec((1, block_b), lambda i: (0, i)),
        ),
        compiler_params=pltpu.CompilerParams(
            dimension_semantics=("parallel",),
            vmem_limit_bytes=32 * 1024 * 1024),
    )


def position_normal_forward(state, u, s, sigma_r=None, block_b=1024):
    """u, s: (B, 2) in [-1, 1]; returns ndf (B,)."""
    sigma_r = float(sigma_r) if sigma_r is not None else state.sigma_r_min
    H, W = state.H, state.W
    HW = H * W
    n_rows = state.table.shape[0]                         # 2 * C * 16 = 64
    B = u.shape[0]

    # Lane block sizing: multiples of 128, capped so the grid always has at
    # least 2 blocks (keeps both v7x TensorCores busy; harmless on v5e/v6e).
    block_b = max(128, (int(block_b) // 128) * 128)
    block_b = min(block_b, _round_up(_cdiv(B, 2), 128))
    n_blocks = max(2, _cdiv(B, block_b))
    B_pad = n_blocks * block_b

    # Merged query slab (4, B_pad): rows 0:2 = u^T, rows 2:4 = s^T.  Zero
    # padding keeps every padded query valid (uv = 0.5 -> in-range index).
    # TODO(synk): callers that already hold (4, B) lane-major queries can pass
    # them straight through and skip this transpose.
    q = jnp.zeros((4, B_pad), jnp.float32)
    q = q.at[0:2, :B].set(u.astype(jnp.float32).T)
    q = q.at[2:4, :B].set(s.astype(jnp.float32).T)

    common = dict(n_rows=n_rows, HW=HW, block_b=block_b, n_blocks=n_blocks,
                  B_pad=B_pad, H=H, W=W, sigma_r=sigma_r)
    try:
        out = jax.block_until_ready(
            _make_forward_call(single_buffer_table=True, **common)(state.table, q))
    except Exception:
        # pl.Buffered(1) (single-buffered resident table) not supported on this
        # jax/libtpu build; fall back to default double buffering.
        out = _make_forward_call(single_buffer_table=False, **common)(state.table, q)
    return out[0, :B]


# ----------------------------------------------------------------------------
# Pure-JAX reference of forward() for verification
# ----------------------------------------------------------------------------

def _getN_ref(coeff, uv):
    H, W, C, _, _ = coeff.shape
    v = uv[:, 0] * H
    u = uv[:, 1] * W
    u0f = jnp.floor(u)
    v0f = jnp.floor(v)
    uf = u - u0f
    vf = v - v0f
    u0 = jnp.mod(u0f.astype(jnp.int32), H)
    v0 = jnp.mod(v0f.astype(jnp.int32), W)
    c = coeff.reshape(H * W, C, 4, 4)[u0 * W + v0]          # (B, C, 4, 4)
    e = jnp.arange(4)
    weight = (uf[:, None, None] ** e[None, :, None]) * (vf[:, None, None] ** e[None, None, :])
    return jnp.einsum("bcij,bij->bc", c, weight)


def _forward_ref(coeff, u, s, sigma_r):
    n = _getN_ref(coeff, u * 0.5 + 0.5)
    return (1.0 / (2.0 * math.pi * sigma_r)) * jnp.exp(
        -0.5 * jnp.sum(((n - s) / sigma_r) ** 2, axis=-1))


# ----------------------------------------------------------------------------

if __name__ == "__main__":
    key = jax.random.PRNGKey(0)
    k1, k2, k3 = jax.random.split(key, 3)

    H = W = 16
    B = 8

    # Synthetic single-channel heightfield (triggers the 1-channel init branch).
    height = 0.1 * jax.random.normal(k1, (H, W, 1), dtype=jnp.float32)
    state = build_position_normal(height, 0.003)

    # Query positions in [-1, 1]; query directions s near the actual normals so
    # the Gaussian NDF is non-degenerate.
    u = jax.random.uniform(k2, (B, 2), minval=-1.0, maxval=1.0, dtype=jnp.float32)
    sigma_r = 0.1  # forward() optional arg; keeps the exponent numerically tame
    n_true = _getN_ref(state.normal_coeff, u * 0.5 + 0.5)
    s = n_true + 0.05 * jax.random.normal(k3, (B, 2), dtype=jnp.float32)

    ndf = position_normal_forward(state, u, s, sigma_r)
    ndf = jax.block_until_ready(ndf)

    ndf_ref = _forward_ref(state.normal_coeff, u, s, sigma_r)
    assert ndf.shape == (B,)
    assert jnp.allclose(ndf, ndf_ref, rtol=1e-2, atol=1e-4), (ndf, ndf_ref)

    print("KERNEL_OK")
</pallas_src>

<mosaic_0001>
module attributes {stable_mosaic.version = 11 : i64} {
  func.func @_ndf_kernel(%arg0: i32, %arg1: memref<64x256xbf16, #tpu.memory_space<vmem>>, %arg2: memref<4x128xf32, #tpu.memory_space<vmem>>, %arg3: memref<1x128xf32, #tpu.memory_space<vmem>>) attributes {dimension_semantics = [#tpu.dimension_semantics<parallel>], iteration_bounds = array<i64: 2>, scalar_prefetch = 0 : i64, scratch_operands = 0 : i64, tpu.core_type = #tpu.core_type<tc>, window_params = [{pipeline_mode = #tpu.pipeline_mode<synchronous>, transform_indices = @transform_0, window_bounds = array<i64: 64, 256>}, {transform_indices = @transform_1, window_bounds = array<i64: 4, 128>}, {transform_indices = @transform_2, window_bounds = array<i64: 1, 128>}]} {
    %c0 = arith.constant 0 : index
    %c0_0 = arith.constant 0 : index
    %0 = vector.load %arg2[%c0, %c0_0] : memref<4x128xf32, #tpu.memory_space<vmem>>, vector<4x128xf32>
    %1 = vector.extract_strided_slice %0 {offsets = [0, 0], sizes = [2, 128], strides = [1, 1]} : vector<4x128xf32> to vector<2x128xf32>
    %cst = arith.constant 5.000000e-01 : f32
    %2 = vector.broadcast %cst : f32 to vector<2x128xf32>
    %3 = arith.mulf %1, %2 : vector<2x128xf32>
    %cst_1 = arith.constant 5.000000e-01 : f32
    %4 = vector.broadcast %cst_1 : f32 to vector<2x128xf32>
    %5 = arith.addf %3, %4 : vector<2x128xf32>
    %6 = vector.extract_strided_slice %5 {offsets = [0, 0], sizes = [1, 128], strides = [1, 1]} : vector<2x128xf32> to vector<1x128xf32>
    %cst_2 = arith.constant 1.600000e+01 : f32
    %7 = vector.broadcast %cst_2 : f32 to vector<1x128xf32>
    %8 = arith.mulf %6, %7 : vector<1x128xf32>
    %9 = vector.extract_strided_slice %5 {offsets = [1, 0], sizes = [1, 128], strides = [1, 1]} : vector<2x128xf32> to vector<1x128xf32>
    %cst_3 = arith.constant 1.600000e+01 : f32
    %10 = vector.broadcast %cst_3 : f32 to vector<1x128xf32>
    %11 = arith.mulf %9, %10 : vector<1x128xf32>
    %12 = math.floor %11 : vector<1x128xf32>
    %13 = math.floor %8 : vector<1x128xf32>
    %14 = arith.subf %11, %12 : vector<1x128xf32>
    %15 = arith.subf %8, %13 : vector<1x128xf32>
    %16 = arith.fptosi %12 : vector<1x128xf32> to vector<1x128xi32>
    %c16_i32 = arith.constant 16 : i32
    %c0_i32 = arith.constant 0 : i32
    %17 = arith.cmpi eq, %c16_i32, %c0_i32 : i32
    %c1_i32 = arith.constant 1 : i32
    %18 = arith.select %17, %c1_i32, %c16_i32 : i32
    %19 = vector.broadcast %18 : i32 to vector<1x128xi32>
    %20 = arith.remsi %16, %19 : vector<1x128xi32>
    %c0_i32_4 = arith.constant 0 : i32
    %21 = vector.broadcast %c0_i32_4 : i32 to vector<1x128xi32>
    %22 = arith.cmpi ne, %20, %21 : vector<1x128xi32>
    %c0_i32_5 = arith.constant 0 : i32
    %23 = vector.broadcast %c0_i32_5 : i32 to vector<1x128xi32>
    %24 = arith.cmpi slt, %20, %23 : vector<1x128xi32>
    %c0_i32_6 = arith.constant 0 : i32
    %25 = arith.cmpi slt, %18, %c0_i32_6 : i32
    %26 = vector.broadcast %25 : i1 to vector<1x128xi1>
    %27 = vector.broadcast %26 : vector<1x128xi1> to vector<1x128xi1>
    %28 = arith.xori %24, %27 : vector<1x128xi1>
    %29 = arith.andi %28, %22 : vector<1x128xi1>
    %30 = vector.broadcast %18 : i32 to vector<1x128xi32>
    %31 = arith.addi %20, %30 : vector<1x128xi32>
    %32 = arith.select %29, %31, %20 : vector<1x128xi1>, vector<1x128xi32>
    %33 = arith.fptosi %13 : vector<1x128xf32> to vector<1x128xi32>
    %c16_i32_7 = arith.constant 16 : i32
    %c0_i32_8 = arith.constant 0 : i32
    %34 = arith.cmpi eq, %c16_i32_7, %c0_i32_8 : i32
    %c1_i32_9 = arith.constant 1 : i32
    %35 = arith.select %34, %c1_i32_9, %c16_i32_7 : i32
    %36 = vector.broadcast %35 : i32 to vector<1x128xi32>
    %37 = arith.remsi %33, %36 : vector<1x128xi32>
    %c0_i32_10 = arith.constant 0 : i32
    %38 = vector.broadcast %c0_i32_10 : i32 to vector<1x128xi32>
    %39 = arith.cmpi ne, %37, %38 : vector<1x128xi32>
    %c0_i32_11 = arith.constant 0 : i32
    %40 = vector.broadcast %c0_i32_11 : i32 to vector<1x128xi32>
    %41 = arith.cmpi slt, %37, %40 : vector<1x128xi32>
    %c0_i32_12 = arith.constant 0 : i32
    %42 = arith.cmpi slt, %35, %c0_i32_12 : i32
    %43 = vector.broadcast %42 : i1 to vector<1x128xi1>
    %44 = vector.broadcast %43 : vector<1x128xi1> to vector<1x128xi1>
    %45 = arith.xori %41, %44 : vector<1x128xi1>
    %46 = arith.andi %45, %39 : vector<1x128xi1>
    %47 = vector.broadcast %35 : i32 to vector<1x128xi32>
    %48 = arith.addi %37, %47 : vector<1x128xi32>
    %49 = arith.select %46, %48, %37 : vector<1x128xi1>, vector<1x128xi32>
    %c16_i32_13 = arith.constant 16 : i32
    %50 = vector.broadcast %c16_i32_13 : i32 to vector<1x128xi32>
    %51 = arith.muli %32, %50 : vector<1x128xi32>
    %52 = arith.addi %51, %49 : vector<1x128xi32>
    %53 = tpu.iota {dimensions = array<i32: 0>} : vector<256x128xi32>
    %54 = vector.broadcast %52 : vector<1x128xi32> to vector<256x128xi32>
    %55 = arith.cmpi eq, %53, %54 : vector<256x128xi32>
    %56 = arith.extui %55 : vector<256x128xi1> to vector<256x128xi32>
    %57 = arith.sitofp %56 : vector<256x128xi32> to vector<256x128xf32>
    %58 = arith.truncf %57 : vector<256x128xf32> to vector<256x128xbf16>
    %c0_14 = arith.constant 0 : index
    %c0_15 = arith.constant 0 : index
    %59 = vector.load %arg1[%c0_14, %c0_15] : memref<64x256xbf16, #tpu.memory_space<vmem>>, vector<64x256xbf16>
    %cst_16 = arith.constant dense<0.000000e+00> : vector<64x128xf32>
    %60 = tpu.matmul %59, %58, %cst_16 {dimension_numbers = #tpu.dot_dimension_numbers<[1], [0], [0], [1], [0, 0, 1, 1], [], []>} : vector<64x256xbf16>, vector<256x128xbf16>, vector<64x128xf32> -> vector<64x128xf32>
    %61 = vector.extract_strided_slice %60 {offsets = [0, 0], sizes = [32, 128], strides = [1, 1]} : vector<64x128xf32> to vector<32x128xf32>
    %62 = vector.extract_strided_slice %60 {offsets = [32, 0], sizes = [32, 128], strides = [1, 1]} : vector<64x128xf32> to vector<32x128xf32>
    %63 = arith.addf %61, %62 : vector<32x128xf32>
    %64 = vector.extract_strided_slice %63 {offsets = [0, 0], sizes = [8, 128], strides = [1, 1]} : vector<32x128xf32> to vector<8x128xf32>
    %65 = vector.extract_strided_slice %63 {offsets = [8, 0], sizes = [8, 128], strides = [1, 1]} : vector<32x128xf32> to vector<8x128xf32>
    %66 = vector.extract_strided_slice %63 {offsets = [16, 0], sizes = [8, 128], strides = [1, 1]} : vector<32x128xf32> to vector<8x128xf32>
    %67 = vector.extract_strided_slice %63 {offsets = [24, 0], sizes = [8, 128], strides = [1, 1]} : vector<32x128xf32> to vector<8x128xf32>
    %68 = vector.broadcast %15 : vector<1x128xf32> to vector<8x128xf32>
    %69 = arith.mulf %67, %68 : vector<8x128xf32>
    %70 = arith.addf %69, %66 : vector<8x128xf32>
    %71 = vector.broadcast %15 : vector<1x128xf32> to vector<8x128xf32>
    %72 = arith.mulf %70, %71 : vector<8x128xf32>
    %73 = arith.addf %72, %65 : vector<8x128xf32>
    %74 = vector.broadcast %15 : vector<1x128xf32> to vector<8x128xf32>
    %75 = arith.mulf %73, %74 : vector<8x128xf32>
    %76 = arith.addf %75, %64 : vector<8x128xf32>
    %77 = vector.extract_strided_slice %76 {offsets = [6, 0], sizes = [2, 128], strides = [1, 1]} : vector<8x128xf32> to vector<2x128xf32>
    %78 = vector.broadcast %14 : vector<1x128xf32> to vector<2x128xf32>
    %79 = arith.mulf %77, %78 : vector<2x128xf32>
    %80 = vector.extract_strided_slice %76 {offsets = [4, 0], sizes = [2, 128], strides = [1, 1]} : vector<8x128xf32> to vector<2x128xf32>
    %81 = arith.addf %79, %80 : vector<2x128xf32>
    %82 = vector.broadcast %14 : vector<1x128xf32> to vector<2x128xf32>
    %83 = arith.mulf %81, %82 : vector<2x128xf32>
    %84 = vector.extract_strided_slice %76 {offsets = [2, 0], sizes = [2, 128], strides = [1, 1]} : vector<8x128xf32> to vector<2x128xf32>
    %85 = arith.addf %83, %84 : vector<2x128xf32>
    %86 = vector.broadcast %14 : vector<1x128xf32> to vector<2x128xf32>
    %87 = arith.mulf %85, %86 : vector<2x128xf32>
    %88 = vector.extract_strided_slice %76 {offsets = [0, 0], sizes = [2, 128], strides = [1, 1]} : vector<8x128xf32> to vector<2x128xf32>
    %89 = arith.addf %87, %88 : vector<2x128xf32>
    %90 = vector.extract_strided_slice %0 {offsets = [2, 0], sizes = [2, 128], strides = [1, 1]} : vector<4x128xf32> to vector<2x128xf32>
    %91 = arith.subf %89, %90 : vector<2x128xf32>
    %cst_17 = arith.constant 1.000000e+01 : f32
    %92 = vector.broadcast %cst_17 : f32 to vector<2x128xf32>
    %93 = arith.mulf %91, %92 : vector<2x128xf32>
    %94 = vector.extract_strided_slice %93 {offsets = [0, 0], sizes = [1, 128], strides = [1, 1]} : vector<2x128xf32> to vector<1x128xf32>
    %95 = vector.extract_strided_slice %93 {offsets = [0, 0], sizes = [1, 128], strides = [1, 1]} : vector<2x128xf32> to vector<1x128xf32>
    %96 = arith.mulf %94, %95 : vector<1x128xf32>
    %97 = vector.extract_strided_slice %93 {offsets = [1, 0], sizes = [1, 128], strides = [1, 1]} : vector<2x128xf32> to vector<1x128xf32>
    %98 = vector.extract_strided_slice %93 {offsets = [1, 0], sizes = [1, 128], strides = [1, 1]} : vector<2x128xf32> to vector<1x128xf32>
    %99 = arith.mulf %97, %98 : vector<1x128xf32>
    %100 = arith.addf %96, %99 : vector<1x128xf32>
    %cst_18 = arith.constant -5.000000e-01 : f32
    %101 = vector.broadcast %cst_18 : f32 to vector<1x128xf32>
    %102 = arith.mulf %101, %100 : vector<1x128xf32>
    %103 = math.exp %102 : vector<1x128xf32>
    %cst_19 = arith.constant 1.5915494 : f32
    %104 = vector.broadcast %cst_19 : f32 to vector<1x128xf32>
    %105 = arith.mulf %104, %103 : vector<1x128xf32>
    %c0_20 = arith.constant 0 : index
    %c0_21 = arith.constant 0 : index
    %106 = vector.load %arg3[%c0_20, %c0_21] : memref<1x128xf32, #tpu.memory_space<vmem>>, vector<1x128xf32>
    tpu.vector_store %arg3[%c0_20, %c0_21], %105 {strides = array<i32>} : memref<1x128xf32, #tpu.memory_space<vmem>>, vector<1x128xf32>,
    return
  }
  func.func @transform_0(%arg0: i32) -> (i32, i32) {
    %c0_i32 = arith.constant 0 : i32
    %c0_i32_0 = arith.constant 0 : i32
    %c0_i32_1 = arith.constant 0 : i32
    return %c0_i32, %c0_i32_0 : i32, i32
  }
  func.func @transform_1(%arg0: i32) -> (i32, i32) {
    %c0_i32 = arith.constant 0 : i32
    %c0_i32_0 = arith.constant 0 : i32
    return %c0_i32, %arg0 : i32, i32
  }
  func.func @transform_2(%arg0: i32) -> (i32, i32) {
    %c0_i32 = arith.constant 0 : i32
    %c0_i32_0 = arith.constant 0 : i32
    return %c0_i32, %arg0 : i32, i32
  }
}

module attributes {stable_mosaic.version = 11 : i64} {
  func.func @_ndf_kernel(%arg0: i32, %arg1: memref<64x256xbf16, #tpu.memory_space<vmem>>, %arg2: memref<4x128xf32, #tpu.memory_space<vmem>>, %arg3: memref<1x128xf32, #tpu.memory_space<vmem>>) attributes {dimension_semantics = [#tpu.dimension_semantics<parallel>], iteration_bounds = array<i64: 2>, scalar_prefetch = 0 : i64, scratch_operands = 0 : i64, tpu.core_type = #tpu.core_type<tc>, window_params = [{pipeline_mode = #tpu.pipeline_mode<synchronous>, transform_indices = @transform_0, window_bounds = array<i64: 64, 256>}, {transform_indices = @transform_1, window_bounds = array<i64: 4, 128>}, {transform_indices = @transform_2, window_bounds = array<i64: 1, 128>}]} {
    %c0 = arith.constant 0 : index
    %c0_0 = arith.constant 0 : index
    %0 = vector.load %arg2[%c0, %c0_0] : memref<4x128xf32, #tpu.memory_space<vmem>>, vector<4x128xf32>
    %1 = vector.extract_strided_slice %0 {offsets = [0, 0], sizes = [2, 128], strides = [1, 1]} : vector<4x128xf32> to vector<2x128xf32>
    %cst = arith.constant 5.000000e-01 : f32
    %2 = vector.broadcast %cst : f32 to vector<2x128xf32>
    %3 = arith.mulf %1, %2 : vector<2x128xf32>
    %cst_1 = arith.constant 5.000000e-01 : f32
    %4 = vector.broadcast %cst_1 : f32 to vector<2x128xf32>
    %5 = arith.addf %3, %4 : vector<2x128xf32>
    %6 = vector.extract_strided_slice %5 {offsets = [0, 0], sizes = [1, 128], strides = [1, 1]} : vector<2x128xf32> to vector<1x128xf32>
    %cst_2 = arith.constant 1.600000e+01 : f32
    %7 = vector.broadcast %cst_2 : f32 to vector<1x128xf32>
    %8 = arith.mulf %6, %7 : vector<1x128xf32>
    %9 = vector.extract_strided_slice %5 {offsets = [1, 0], sizes = [1, 128], strides = [1, 1]} : vector<2x128xf32> to vector<1x128xf32>
    %cst_3 = arith.constant 1.600000e+01 : f32
    %10 = vector.broadcast %cst_3 : f32 to vector<1x128xf32>
    %11 = arith.mulf %9, %10 : vector<1x128xf32>
    %12 = math.floor %11 : vector<1x128xf32>
    %13 = math.floor %8 : vector<1x128xf32>
    %14 = arith.subf %11, %12 : vector<1x128xf32>
    %15 = arith.subf %8, %13 : vector<1x128xf32>
    %16 = arith.fptosi %12 : vector<1x128xf32> to vector<1x128xi32>
    %c16_i32 = arith.constant 16 : i32
    %c0_i32 = arith.constant 0 : i32
    %17 = arith.cmpi eq, %c16_i32, %c0_i32 : i32
    %c1_i32 = arith.constant 1 : i32
    %18 = arith.select %17, %c1_i32, %c16_i32 : i32
    %19 = vector.broadcast %18 : i32 to vector<1x128xi32>
    %20 = arith.remsi %16, %19 : vector<1x128xi32>
    %c0_i32_4 = arith.constant 0 : i32
    %21 = vector.broadcast %c0_i32_4 : i32 to vector<1x128xi32>
    %22 = arith.cmpi ne, %20, %21 : vector<1x128xi32>
    %c0_i32_5 = arith.constant 0 : i32
    %23 = vector.broadcast %c0_i32_5 : i32 to vector<1x128xi32>
    %24 = arith.cmpi slt, %20, %23 : vector<1x128xi32>
    %c0_i32_6 = arith.constant 0 : i32
    %25 = arith.cmpi slt, %18, %c0_i32_6 : i32
    %26 = vector.broadcast %25 : i1 to vector<1x128xi1>
    %27 = vector.broadcast %26 : vector<1x128xi1> to vector<1x128xi1>
    %28 = arith.xori %24, %27 : vector<1x128xi1>
    %29 = arith.andi %28, %22 : vector<1x128xi1>
    %30 = vector.broadcast %18 : i32 to vector<1x128xi32>
    %31 = arith.addi %20, %30 : vector<1x128xi32>
    %32 = arith.select %29, %31, %20 : vector<1x128xi1>, vector<1x128xi32>
    %33 = arith.fptosi %13 : vector<1x128xf32> to vector<1x128xi32>
    %c16_i32_7 = arith.constant 16 : i32
    %c0_i32_8 = arith.constant 0 : i32
    %34 = arith.cmpi eq, %c16_i32_7, %c0_i32_8 : i32
    %c1_i32_9 = arith.constant 1 : i32
    %35 = arith.select %34, %c1_i32_9, %c16_i32_7 : i32
    %36 = vector.broadcast %35 : i32 to vector<1x128xi32>
    %37 = arith.remsi %33, %36 : vector<1x128xi32>
    %c0_i32_10 = arith.constant 0 : i32
    %38 = vector.broadcast %c0_i32_10 : i32 to vector<1x128xi32>
    %39 = arith.cmpi ne, %37, %38 : vector<1x128xi32>
    %c0_i32_11 = arith.constant 0 : i32
    %40 = vector.broadcast %c0_i32_11 : i32 to vector<1x128xi32>
    %41 = arith.cmpi slt, %37, %40 : vector<1x128xi32>
    %c0_i32_12 = arith.constant 0 : i32
    %42 = arith.cmpi slt, %35, %c0_i32_12 : i32
    %43 = vector.broadcast %42 : i1 to vector<1x128xi1>
    %44 = vector.broadcast %43 : vector<1x128xi1> to vector<1x128xi1>
    %45 = arith.xori %41, %44 : vector<1x128xi1>
    %46 = arith.andi %45, %39 : vector<1x128xi1>
    %47 = vector.broadcast %35 : i32 to vector<1x128xi32>
    %48 = arith.addi %37, %47 : vector<1x128xi32>
    %49 = arith.select %46, %48, %37 : vector<1x128xi1>, vector<1x128xi32>
    %c16_i32_13 = arith.constant 16 : i32
    %50 = vector.broadcast %c16_i32_13 : i32 to vector<1x128xi32>
    %51 = arith.muli %32, %50 : vector<1x128xi32>
    %52 = arith.addi %51, %49 : vector<1x128xi32>
    %53 = tpu.iota {dimensions = array<i32: 0>} : vector<256x128xi32>
    %54 = vector.broadcast %52 : vector<1x128xi32> to vector<256x128xi32>
    %55 = arith.cmpi eq, %53, %54 : vector<256x128xi32>
    %56 = arith.extui %55 : vector<256x128xi1> to vector<256x128xi32>
    %57 = arith.sitofp %56 : vector<256x128xi32> to vector<256x128xf32>
    %58 = arith.truncf %57 : vector<256x128xf32> to vector<256x128xbf16>
    %c0_14 = arith.constant 0 : index
    %c0_15 = arith.constant 0 : index
    %59 = vector.load %arg1[%c0_14, %c0_15] : memref<64x256xbf16, #tpu.memory_space<vmem>>, vector<64x256xbf16>
    %cst_16 = arith.constant dense<0.000000e+00> : vector<64x128xf32>
    %60 = tpu.matmul %59, %58, %cst_16 {dimension_numbers = #tpu.dot_dimension_numbers<[1], [0], [0], [1], [0, 0, 1, 1], [], []>} : vector<64x256xbf16>, vector<256x128xbf16>, vector<64x128xf32> -> vector<64x128xf32>
    %61 = vector.extract_strided_slice %60 {offsets = [0, 0], sizes = [32, 128], strides = [1, 1]} : vector<64x128xf32> to vector<32x128xf32>
    %62 = vector.extract_strided_slice %60 {offsets = [32, 0], sizes = [32, 128], strides = [1, 1]} : vector<64x128xf32> to vector<32x128xf32>
    %63 = arith.addf %61, %62 : vector<32x128xf32>
    %64 = vector.extract_strided_slice %63 {offsets = [0, 0], sizes = [8, 128], strides = [1, 1]} : vector<32x128xf32> to vector<8x128xf32>
    %65 = vector.extract_strided_slice %63 {offsets = [8, 0], sizes = [8, 128], strides = [1, 1]} : vector<32x128xf32> to vector<8x128xf32>
    %66 = vector.extract_strided_slice %63 {offsets = [16, 0], sizes = [8, 128], strides = [1, 1]} : vector<32x128xf32> to vector<8x128xf32>
    %67 = vector.extract_strided_slice %63 {offsets = [24, 0], sizes = [8, 128], strides = [1, 1]} : vector<32x128xf32> to vector<8x128xf32>
    %68 = vector.broadcast %15 : vector<1x128xf32> to vector<8x128xf32>
    %69 = arith.mulf %67, %68 : vector<8x128xf32>
    %70 = arith.addf %69, %66 : vector<8x128xf32>
    %71 = vector.broadcast %15 : vector<1x128xf32> to vector<8x128xf32>
    %72 = arith.mulf %70, %71 : vector<8x128xf32>
    %73 = arith.addf %72, %65 : vector<8x128xf32>
    %74 = vector.broadcast %15 : vector<1x128xf32> to vector<8x128xf32>
    %75 = arith.mulf %73, %74 : vector<8x128xf32>
    %76 = arith.addf %75, %64 : vector<8x128xf32>
    %77 = vector.extract_strided_slice %76 {offsets = [6, 0], sizes = [2, 128], strides = [1, 1]} : vector<8x128xf32> to vector<2x128xf32>
    %78 = vector.broadcast %14 : vector<1x128xf32> to vector<2x128xf32>
    %79 = arith.mulf %77, %78 : vector<2x128xf32>
    %80 = vector.extract_strided_slice %76 {offsets = [4, 0], sizes = [2, 128], strides = [1, 1]} : vector<8x128xf32> to vector<2x128xf32>
    %81 = arith.addf %79, %80 : vector<2x128xf32>
    %82 = vector.broadcast %14 : vector<1x128xf32> to vector<2x128xf32>
    %83 = arith.mulf %81, %82 : vector<2x128xf32>
    %84 = vector.extract_strided_slice %76 {offsets = [2, 0], sizes = [2, 128], strides = [1, 1]} : vector<8x128xf32> to vector<2x128xf32>
    %85 = arith.addf %83, %84 : vector<2x128xf32>
    %86 = vector.broadcast %14 : vector<1x128xf32> to vector<2x128xf32>
    %87 = arith.mulf %85, %86 : vector<2x128xf32>
    %88 = vector.extract_strided_slice %76 {offsets = [0, 0], sizes = [2, 128], strides = [1, 1]} : vector<8x128xf32> to vector<2x128xf32>
    %89 = arith.addf %87, %88 : vector<2x128xf32>
    %90 = vector.extract_strided_slice %0 {offsets = [2, 0], sizes = [2, 128], strides = [1, 1]} : vector<4x128xf32> to vector<2x128xf32>
    %91 = arith.subf %89, %90 : vector<2x128xf32>
    %cst_17 = arith.constant 1.000000e+01 : f32
    %92 = vector.broadcast %cst_17 : f32 to vector<2x128xf32>
    %93 = arith.mulf %91, %92 : vector<2x128xf32>
    %94 = vector.extract_strided_slice %93 {offsets = [0, 0], sizes = [1, 128], strides = [1, 1]} : vector<2x128xf32> to vector<1x128xf32>
    %95 = vector.extract_strided_slice %93 {offsets = [0, 0], sizes = [1, 128], strides = [1, 1]} : vector<2x128xf32> to vector<1x128xf32>
    %96 = arith.mulf %94, %95 : vector<1x128xf32>
    %97 = vector.extract_strided_slice %93 {offsets = [1, 0], sizes = [1, 128], strides = [1, 1]} : vector<2x128xf32> to vector<1x128xf32>
    %98 = vector.extract_strided_slice %93 {offsets = [1, 0], sizes = [1, 128], strides = [1, 1]} : vector<2x128xf32> to vector<1x128xf32>
    %99 = arith.mulf %97, %98 : vector<1x128xf32>
    %100 = arith.addf %96, %99 : vector<1x128xf32>
    %cst_18 = arith.constant -5.000000e-01 : f32
    %101 = vector.broadcast %cst_18 : f32 to vector<1x128xf32>
    %102 = arith.mulf %101, %100 : vector<1x128xf32>
    %103 = math.exp %102 : vector<1x128xf32>
    %cst_19 = arith.constant 1.5915494 : f32
    %104 = vector.broadcast %cst_19 : f32 to vector<1x128xf32>
    %105 = arith.mulf %104, %103 : vector<1x128xf32>
    %c0_20 = arith.constant 0 : index
    %c0_21 = arith.constant 0 : index
    %106 = vector.load %arg3[%c0_20, %c0_21] : memref<1x128xf32, #tpu.memory_space<vmem>>, vector<1x128xf32>
    tpu.vector_store %arg3[%c0_20, %c0_21], %105 {strides = array<i32>} : memref<1x128xf32, #tpu.memory_space<vmem>>, vector<1x128xf32>,
    return
  }
  func.func @transform_0(%arg0: i32) -> (i32, i32) {
    %c0_i32 = arith.constant 0 : i32
    %c0_i32_0 = arith.constant 0 : i32
    %c0_i32_1 = arith.constant 0 : i32
    return %c0_i32, %c0_i32_0 : i32, i32
  }
  func.func @transform_1(%arg0: i32) -> (i32, i32) {
    %c0_i32 = arith.constant 0 : i32
    %c0_i32_0 = arith.constant 0 : i32
    return %c0_i32, %arg0 : i32, i32
  }
  func.func @transform_2(%arg0: i32) -> (i32, i32) {
    %c0_i32 = arith.constant 0 : i32
    %c0_i32_0 = arith.constant 0 : i32
    return %c0_i32, %arg0 : i32, i32
  }
}

</mosaic_0001>

<bundles_post_ra>
// kernel: tpu_custom_call.1
= control target key start
LH: loop header
LB: loop body
LE: loop exit
PB: predicated region body
PF: predicated region fallthrough
CT: control target
= control target key end

     0   :  { %7 = vsyncpa [#allocation3], 0  ;;  %s1280_s0 = inlined_call_operand.hbm [shape: bf16[64,256], index: 0, kind: input, shape index: {}]   ;;  %s1281_s1 = inlined_call_operand.hbm [shape: f32[4,256], index: 1, kind: input, shape index: {}]   ;;  %s1282_s2 = inlined_call_operand.hbm [shape: f32[1,256], index: 2, kind: output, shape index: {}]  }
   0x1   :  { %8 = vsyncpa [#allocation6], 0 }
   0x2   :  { %10 = vsyncpa [#allocation6 + $0x1], 0 }
   0x3   :  { %11 = vsyncpa [#allocation4], 0 }
   0x4   :  { %13 = vsyncpa [#allocation4 + $0x1], 0  ;;  %s963_s9 = smov 0   ;;  %s965_s10 = smov 0  }
   0x5   :  { %s967_s11 = smov 0   ;;  %s969_s12 = smov 0  }
   0x6 LB: > { %s984_s13 = sadd.s32 4294967295, %s940_s12   ;;  %s595_s14 = sadd.s32 4294967294, %s940_s12   ;;  %s940_s12 = sphi %s969_s12, %s1302_s12   ;;  %s936_s11 = sphi %s967_s11, %s1301_s11   ;;  %s932_s10 = sphi %s965_s10, %s1300_s10   ;;  %s928_s9 = sphi %s963_s9, %s1299_s9  }
   0x7   : > { %p60_p0 = scmp.ne.s32.totalorder %s932_s10, %s928_s9  ;;  %p1283_p1 = scmp.eq.s32.totalorder %s984_s13, 0 }
   0x8   : > { %p90_p3 = scmp.eq.s32.totalorder %s595_s14, 1  ;;  %p596_p5 = scmp.ge.s32.totalorder %s940_s12, 1 }
   0x9   : > { %p993_p4 = por %p1283_p1, %p60_p0  ;;  %p97_p7 = scmp.lt.s32.totalorder %s940_s12, 3 }
   0xa   : > { %p998_p6 = por %p90_p3, %p60_p0  ;;  %s942_s18 = smov [#allocation2]  }
   0xb   : > { %s1286_s15 = scalar_select %p993_p4, 1, 0 }
   0xc   : > { %s1287_s16 = scalar_select %p998_p6, 1, 0 }
   0xd   : > { %p1003_p8 = pnand %p596_p5, %p97_p7  ;;  %s109_s19 = sshll.u32 %s942_s18, 4  ;;  %s1007_s19 = int_to_ptr.vmem [resolvable:$true] %s109_s19 }
   0xe   : > { %s1019_s21 = sadd.s32 1, %s940_s12   ;;  %s47_s22 = sadd.s32 1, %s936_s11 }
   0xf   : > { %s1288_s17 = scalar_select %p1003_p8, 1, 0 }
  0x10   : > { %p746_p9 = pneg %p1003_p8  ;;  %s44_s23 = ssub.s32 %s940_s12, %s1019_s21 }
  0x11   : > { %s812_s26 = scalar_lea.hbm %s1280_s0, 1024 }
  0x12   : > { %p1014_p11 = pnand %p746_p9, %p1283_p1  ;;  %p813_p12 = scmp.ne.s32.totalorder %s1280_s0, %s812_s26 }
  0x13   : > { %p819_p5 = scmp.lt.u32.totalorder %s812_s26, %s1280_s0 }
  0x14   : > { %p814_p13 = pneg %p1014_p11 }
  0x16   : > { %p815_p0 = pnand %p814_p13, %p813_p12 }
  0x18   : > { %p816_p3 = pneg %p815_p0 }
  0x1a   : > { %p821_p7 = pnand %p819_p5, %p816_p3 }
  0x1c   : > { %824 = shalt.err (!%p821_p7)
}
  0x1d   : > { %s825_s3 = scalar_lea.vmem %s1007_s19, 1024  ;;  %p833_p2 = scmp.lt.s32.totalorder %s1007_s19, %s1007_s19 }
  0x1e   : > { %p826_p9 = scmp.ne.s32.totalorder %s1007_s19, %s825_s3  ;;  %p834_p6 = scmp.lt.s32.totalorder %s825_s3, %s825_s3 }
  0x20   : > { %p828_p10 = pnand %p826_p9, %p814_p13  ;;  %p835_p4 = por %p834_p6, %p833_p2 }
  0x22   : > { %p829_p1 = pneg %p828_p10 }
  0x24   : > { %p836_p8 = pnand %p835_p4, %p829_p1 }
  0x26   : > { %839 = shalt.err (!%p836_p8)
}
  0x27   : > { %s943_s4 = smov 128   ;;  %s944_s5 = smov 8  }
  0x28   : > { %749 = dma.hbm_to_vmem [thread:$0]  (!%p1014_p11), %s1280_s0, 1024, %s1007_s19, [#allocation3], %s943_s4, %s943_s4, %s944_s5  }
  0x29   : > { %p45_p2 = scmp.eq.s32.totalorder %s44_s23, 0  ;;  %p54_p1 = scmp.ne.s32.totalorder %s936_s11, %s932_s10 }
  0x2a   : > { %p55_p4 = scmp.eq.s32.totalorder %s940_s12, 0  ;;  %p759_p6 = scmp.lt.s32.totalorder %s940_s12, 2 }
  0x2b   : > { %s1050_s8 = scalar_select %p45_p2, %s936_s11, %s47_s22  }
  0x2c   : > { %p56_p8 = por %p55_p4, %p54_p1  ;;  %p1290_p10 = scmp.eq.s32.totalorder %s984_s13, 1 }
  0x2d   : > { %s123_s18 = sand.u32 1, %s936_s11   ;;  %s600_s24 = sshll.u32 %s940_s12, 6 }
  0x2e   : > { %p1054_p12 = por %p1290_p10, %p54_p1  ;;  %s599_s25 = sshll.u32 %s123_s18, 2 }
  0x2f   : > { %s1063_s27 = scalar_lea.hbm %s1281_s1, %s600_s24  ;;  %s127_s19 = scalar_lea.vmem [#allocation5], %s599_s25 }
  0x30   : > { %s134_s22 = sshll.u32 %s127_s19, 4  ;;  %p1065_p11 = pnand %p759_p6, %p56_p8  ;;  %s1069_s22 = int_to_ptr.vmem [resolvable:$true] %s134_s22 }
  0x31   : > { %s124_s28 = scalar_lea.sflag [#allocation6], %s123_s18  ;;  %s840_s29 = scalar_lea.hbm %s1063_s27, 64 }
  0x32   : > { %p841_p13 = scmp.ne.s32.totalorder %s1063_s27, %s840_s29  ;;  %p842_p0 = pneg %p1065_p11 }
  0x33   : > { %s845_s4 = scalar_lea.hbm %s1281_s1, 128  ;;  %p846_p7 = scmp.lt.u32.totalorder %s1063_s27, %s1281_s1 }
  0x34   : > { %p843_p3 = pnand %p842_p0, %p841_p13  ;;  %p847_p9 = scmp.lt.u32.totalorder %s845_s4, %s840_s29 }
  0x35   : > { %p849_p1 = scmp.lt.u32.totalorder %s840_s29, %s1063_s27 }
  0x36   : > { %p844_p5 = pneg %p843_p3  ;;  %p848_p2 = por %p847_p9, %p846_p7 }
  0x38   : > { %p850_p4 = por %p849_p1, %p848_p2 }
  0x3a   : > { %p851_p6 = pnand %p850_p4, %p844_p5 }
  0x3c   : > { %854 = shalt.err (!%p851_p6)
}
  0x3d   : > { %s855_s7 = scalar_lea.vmem %s1069_s22, 64  ;;  %s945_s18 = smov [#allocation5]  }
  0x3e   : > { %p856_p8 = scmp.ne.s32.totalorder %s1069_s22, %s855_s7  ;;  %s860_s24 = sshll.u32 %s945_s18, 4  ;;  %s861_s24 = int_to_ptr.vmem [resolvable:$false] %s860_s24 }
  0x3f   : > { %s862_s25 = scalar_lea.vmem %s861_s24, 128  ;;  %p863_p3 = scmp.lt.s32.totalorder %s1069_s22, %s861_s24 }
  0x40   : > { %p858_p10 = pnand %p856_p8, %p842_p0  ;;  %p864_p7 = scmp.lt.s32.totalorder %s862_s25, %s855_s7 }
  0x42   : > { %p859_p13 = pneg %p858_p10  ;;  %p865_p9 = por %p864_p7, %p863_p3 }
  0x44   : > { %p866_p2 = pnand %p865_p9, %p859_p13 }
  0x46   : > { %869 = shalt.err (!%p866_p2)
}
  0x47   : > { %753 = dma.hbm_to_vmem [thread:$0]  (!%p1065_p11), %s1063_s27, 64, %s1069_s22, %s124_s28  }
  0x48   : > { %p1293_p5 = scmp.ne.s32.totalorder %s1288_s17, 0 }
  0x49   : > { %p1294_p0 = scmp.eq.s32.totalorder (!%p1293_p5), %s984_s13, 0 }
  0x4a   : > { %143 = sbr.rel (%p1293_p5) target bundleno = 443 (0x1bb), region = 28 }
  0x51   : > { %915 = dma.done.wait (%p1294_p0), [#allocation3], 1024   ;;  %p1295_p1 = pmov %p1294_p0 }
  0x52   : > { %s1103_s20 = sand.u32 1, %s932_s10   ;;  %p1296_p4 = scmp.ne.s32.totalorder %s1286_s15, 0 }
  0x53   : > { %917 = vsyncadd (%p1295_p1), [#allocation3], 4294966272  ;;  %s603_s26 = sshll.u32 %s1103_s20, 2  ;;  %s150_s19 = scalar_lea.sflag [#allocation6], %s1103_s20 }
  0x54   : > { %s153_s23 = scalar_lea.vmem [#allocation5], %s603_s26 }
  0x55   : > { %919 = dma.done.wait (%p1296_p4), %s150_s19, 64  }
  0x56   : > { %921 = vsyncadd (%p1296_p4), %s150_s19, 4294967232  ;;  %v1111_v0 = vld [vmem:[%s153_s23] sm:$0xf]  ;;  %v196_v12 = vlaneseq  ;;  %v946_v34 = vmov 1.0|1.0   ;;  %s677_s15 = sshll.u32 %s984_s13, 4 }
  0x57   : > { %v175_v1 = vmul.f32 0.5, %v1111_v0  ;;  %v800_v3 = vld [vmem:[#allocation2 + $0x4] ss:$8 sps:$4 sm:$0xff]   ;;  %v798_v55 = vld [vmem:[#allocation2] ss:$8 sps:$4 sm:$0xff]   ;;  %s172_s17 = scalar_lea.vmem [#allocation7], %s1103_s20  ;;  %s1236_s29 = scalar_lea.hbm %s1282_s2, %s677_s15 }
  0x58   : > { %425 = vmatprep.mubr.bf16.mxu0 %v800_v3  ;;  %v803_v5 = vld [vmem:[#allocation2 + $0x24] ss:$8 sps:$4 sm:$0xff]   ;;  %v1119_v15 = vshrl.u32 %v196_v12, 7  ;;  %v801_v56 = vld [vmem:[#allocation2 + $0x20] ss:$8 sps:$4 sm:$0xff]   ;;  %s517_s27 = sshll.u32 %s172_s17, 4  ;;  %s1238_s27 = int_to_ptr.vmem [resolvable:$true] %s517_s27 }
  0x59   : > { %v176_v2 = vadd.f32 0.5, %v175_v1  ;;  %441 = vmatprep.mubr.bf16.mxu1 %v803_v5  ;;  %v804_v57 = vld [vmem:[#allocation2 + $0x14] ss:$8 sps:$4 sm:$0xff]   ;;  %v808_v59 = vld [vmem:[#allocation2 + $0x10] ss:$8 sps:$4 sm:$0xff]   ;;  %s505_s30 = scalar_lea.sflag [#allocation4], %s1103_s20 }
  0x5a   : > { %v231_v20 = vsub.s32 1, %v1119_v15  ;;  %v213_v22 = vadd.s32 128, %v1119_v15  ;;  %v214_v23 = vadd.s32 136, %v1119_v15  ;;  %v198_v24 = vadd.s32 8, %v1119_v15  ;;  %v806_v58 = vld [vmem:[#allocation2 + $0x34] ss:$8 sps:$4 sm:$0xff]  }
  0x5b   : > { %v1114_v4 = vmul.f32 16.0, %v176_v2  ;;  %v215_v25 = vadd.s32 144, %v1119_v15  ;;  %v216_v26 = vadd.s32 152, %v1119_v15  ;;  %v199_v27 = vadd.s32 16, %v1119_v15  ;;  %v809_v60 = vld [vmem:[#allocation2 + $0x30] ss:$8 sps:$4 sm:$0xff]  }
  0x5c   : > { %v200_v28 = vadd.s32 24, %v1119_v15  ;;  %v217_v30 = vadd.s32 160, %v1119_v15  ;;  %v218_v31 = vadd.s32 168, %v1119_v15  ;;  %v201_v32 = vadd.s32 32, %v1119_v15  ;;  %s870_s3 = scalar_lea.vmem %s1238_s27, 16  ;;  %s947_s13 = smov [#allocation7]  }
  0x5d   : > { %v178_v6 = vfloor.f32 %v1114_v4  ;;  %v202_v33 = vadd.s32 40, %v1119_v15  ;;  %v219_v35 = vadd.s32 176, %v1119_v15  ;;  %v220_v36 = vadd.s32 184, %v1119_v15  ;;  %p871_p11 = scmp.ne.s32.totalorder %s1238_s27, %s870_s3  ;;  %s874_s4 = sshll.u32 %s947_s13, 4  ;;  %s875_s4 = int_to_ptr.vmem [resolvable:$false] %s874_s4 }
  0x5e   : > { %v203_v37 = vadd.s32 48, %v1119_v15  ;;  %v204_v38 = vadd.s32 56, %v1119_v15  ;;  %v221_v39 = vadd.s32 192, %v1119_v15  ;;  %v222_v40 = vadd.s32 200, %v1119_v15  ;;  %s876_s5 = scalar_lea.vmem %s875_s4, 32  ;;  %p877_p10 = scmp.lt.s32.totalorder %s1238_s27, %s875_s4 }
  0x5f   : > { %v736_v7 = vtrunc.f32 %v178_v6  ;;  %v205_v41 = vadd.s32 64, %v1119_v15  ;;  %v206_v42 = vadd.s32 72, %v1119_v15  ;;  %v223_v43 = vadd.s32 208, %v1119_v15  ;;  %p872_p6 = pnand %p871_p11, %p1054_p12  ;;  %p878_p13 = scmp.lt.s32.totalorder %s876_s5, %s870_s3 }
  0x60   : > { %v224_v44 = vadd.s32 216, %v1119_v15  ;;  %v207_v45 = vadd.s32 80, %v1119_v15  ;;  %v208_v46 = vadd.s32 88, %v1119_v15  ;;  %v225_v47 = vadd.s32 224, %v1119_v15 }
  0x61   : > { %v737_v8 = vcvt.f32.s32 %v736_v7  ;;  %v226_v48 = vadd.s32 232, %v1119_v15  ;;  %v209_v49 = vadd.s32 96, %v1119_v15  ;;  %v210_v50 = vadd.s32 104, %v1119_v15  ;;  %p873_p8 = pneg %p872_p6  ;;  %p879_p3 = por %p878_p13, %p877_p10 }
  0x62   : > { %v227_v51 = vadd.s32 240, %v1119_v15  ;;  %v228_v52 = vadd.s32 248, %v1119_v15  ;;  %v211_v53 = vadd.s32 112, %v1119_v15  ;;  %v212_v54 = vadd.s32 120, %v1119_v15 }
  0x63   : > { %v182_v9 = vsub.s32 0, %v737_v8  ;;  %vm181_vm0 = vcmp.lt.s32.totalorder %v737_v8, 0  ;;  %p880_p7 = pnand %p879_p3, %p873_p8 }
  0x65   : > { %v604_v10 = vmin.u32 %v737_v8, %v182_v9 }
  0x67   : > { %v185_v11 = vand.u32 15, %v604_v10 }
  0x69   : > { %v186_v13 = vsub.s32 0, %v185_v11 }
  0x6b   : > { %v187_v14 = vsel %vm181_vm0, %v186_v13, %v185_v11 }
  0x6c   : > { %vm188_vm1 = vcmp.ne.s32.totalorder %v187_v14, 0  ;;  %vm189_vm2 = vcmp.lt.s32.totalorder %v187_v14, 0  ;;  %v191_v16 = vadd.s32 16, %v187_v14 }
  0x6d   : > { %vm190_vm3 = vmand %vm189_vm2, %vm188_vm1 }
  0x6e   : > { %v192_v17 = vsel %vm190_vm3, %v191_v16, %v187_v14 }
  0x6f   : > { %v193_v18 = vmul.u32 16, %v192_v17  ;;  %v194_v19 = vrot.slane %v192_v17, 7  ;;  %v179_v17 = vsub.f32 %v1114_v4, %v178_v6 }
  0x71   : > { %v195_v21 = vadd.s32 %v194_v19, %v193_v18  ;;  %v464_v18 = vsub.s32 0, %v1119_v15  ;;  %v475_v6 = vrot.slane %v179_v17, %v231_v20 }
  0x73   : > { %v1131_v29 = vrot.slane %v195_v21, %v231_v20 }
  0x75   : > { %vm249_vm4 = vcmp.eq.s32.totalorder %v213_v22, %v1131_v29  ;;  %vm250_vm5 = vcmp.eq.s32.totalorder %v214_v23, %v1131_v29  ;;  %vm233_vm6 = vcmp.eq.s32.totalorder %v1119_v15, %v1131_v29  ;;  %vm234_vm7 = vcmp.eq.s32.totalorder %v198_v24, %v1131_v29 }
  0x76   : > { %vm661_vm8 = vmpackc.low %vm250_vm5, %vm249_vm4  ;;  %vm251_vm9 = vcmp.eq.s32.totalorder %v215_v25, %v1131_v29  ;;  %vm252_vm10 = vcmp.eq.s32.totalorder %v216_v26, %v1131_v29  ;;  %vm235_vm11 = vcmp.eq.s32.totalorder %v199_v27, %v1131_v29  ;;  %vm236_vm12 = vcmp.eq.s32.totalorder %v200_v28, %v1131_v29 }
  0x77   : > { %680 = vmatprep.subr.msk.bf16.mxu0 %vm661_vm8, %v946_v34  ;;  %720 = vmatprep.subr.msk.bf16.mxu1 %vm661_vm8, %v946_v34  ;;  %vm645_vm13 = vmpackc.low %vm234_vm7, %vm233_vm6  ;;  %vm253_vm14 = vcmp.eq.s32.totalorder %v217_v30, %v1131_v29  ;;  %vm254_vm15 = vcmp.eq.s32.totalorder %v218_v31, %v1131_v29  ;;  %vm237_vm3 = vcmp.eq.s32.totalorder %v201_v32, %v1131_v29 }
  0x78   : > { %681 = vmatpush3.bf16.msk.msra.mxu0 %vm645_vm13, %v946_v34  ;;  %728 = vmatpush3.bf16.msk.msra.mxu1 %vm645_vm13, %v946_v34  ;;  %vm663_vm0 = vmpackc.low %vm252_vm10, %vm251_vm9  ;;  %vm238_vm4 = vcmp.eq.s32.totalorder %v202_v33, %v1131_v29  ;;  %vm255_vm5 = vcmp.eq.s32.totalorder %v219_v35, %v1131_v29  ;;  %vm256_vm6 = vcmp.eq.s32.totalorder %v220_v36, %v1131_v29 }
  0x79   : > { %682 = vmatprep.subr.msk.bf16.mxu0 %vm663_vm0, %v946_v34  ;;  %721 = vmatprep.subr.msk.bf16.mxu1 %vm663_vm0, %v946_v34  ;;  %vm647_vm1 = vmpackc.low %vm236_vm12, %vm235_vm11  ;;  %vm239_vm9 = vcmp.eq.s32.totalorder %v203_v37, %v1131_v29  ;;  %vm240_vm10 = vcmp.eq.s32.totalorder %v204_v38, %v1131_v29  ;;  %vm257_vm11 = vcmp.eq.s32.totalorder %v221_v39, %v1131_v29 }
  0x7a   : > { %vm665_vm2 = vmpackc.low %vm254_vm15, %vm253_vm14  ;;  %vm258_vm12 = vcmp.eq.s32.totalorder %v222_v40, %v1131_v29  ;;  %vm241_vm15 = vcmp.eq.s32.totalorder %v205_v41, %v1131_v29  ;;  %vm242_vm0 = vcmp.eq.s32.totalorder %v206_v42, %v1131_v29  ;;  %v465_v31 = vrot.slane %v179_v17, %v464_v18 }
  0x7b   : > { %vm649_vm7 = vmpackc.low %vm238_vm4, %vm237_vm3 }
  0x7c   : > { %683 = vmatpush3.bf16.msk.msra.mxu0 %vm647_vm1, %v946_v34  ;;  %729 = vmatpush3.bf16.msk.msra.mxu1 %vm647_vm1, %v946_v34  ;;  %vm667_vm8 = vmpackc.low %vm256_vm6, %vm255_vm5  ;;  %vm259_vm1 = vcmp.eq.s32.totalorder %v223_v43, %v1131_v29  ;;  %vm243_vm5 = vcmp.eq.s32.totalorder %v207_v45, %v1131_v29  ;;  %vm244_vm6 = vcmp.eq.s32.totalorder %v208_v46, %v1131_v29  ;;  %v490_v46 = vrot.slane %v1111_v0, 4 }
  0x7d   : > { %684 = vmatprep.subr.msk.bf16.mxu0 %vm665_vm2, %v946_v34  ;;  %722 = vmatprep.subr.msk.bf16.mxu1 %vm665_vm2, %v946_v34  ;;  %vm651_vm13 = vmpackc.low %vm240_vm10, %vm239_vm9  ;;  %vm260_vm2 = vcmp.eq.s32.totalorder %v224_v44, %v1131_v29 }
  0x7e   : > { %vm669_vm14 = vmpackc.low %vm258_vm12, %vm257_vm11  ;;  %vm245_vm11 = vcmp.eq.s32.totalorder %v209_v49, %v1131_v29  ;;  %vm246_vm12 = vcmp.eq.s32.totalorder %v210_v50, %v1131_v29 }
  0x7f   : > { %vm653_vm3 = vmpackc.low %vm242_vm0, %vm241_vm15 }
  0x80   : > { %685 = vmatpush3.bf16.msk.msra.mxu0 %vm649_vm7, %v946_v34  ;;  %730 = vmatpush3.bf16.msk.msra.mxu1 %vm649_vm7, %v946_v34  ;;  %vm671_vm4 = vmpackc.low %vm260_vm2, %vm259_vm1  ;;  %vm261_vm7 = vcmp.eq.s32.totalorder %v225_v47, %v1131_v29  ;;  %vm247_vm1 = vcmp.eq.s32.totalorder %v211_v53, %v1131_v29  ;;  %vm248_vm2 = vcmp.eq.s32.totalorder %v212_v54, %v1131_v29 }
  0x81   : > { %686 = vmatprep.subr.msk.bf16.mxu0 %vm667_vm8, %v946_v34  ;;  %723 = vmatprep.subr.msk.bf16.mxu1 %vm667_vm8, %v946_v34  ;;  %vm262_vm8 = vcmp.eq.s32.totalorder %v226_v48, %v1131_v29  ;;  %vm655_vm9 = vmpackc.low %vm244_vm6, %vm243_vm5 }
  0x82   : > { %vm673_vm10 = vmpackc.low %vm262_vm8, %vm261_vm7 }
  0x83   : > { %vm657_vm15 = vmpackc.low %vm246_vm12, %vm245_vm11 }
  0x84   : > { %687 = vmatpush3.bf16.msk.msra.mxu0 %vm651_vm13, %v946_v34  ;;  %731 = vmatpush3.bf16.msk.msra.mxu1 %vm651_vm13, %v946_v34  ;;  %vm263_vm13 = vcmp.eq.s32.totalorder %v227_v51, %v1131_v29 }
  0x85   : > { %688 = vmatprep.subr.msk.bf16.mxu0 %vm669_vm14, %v946_v34  ;;  %724 = vmatprep.subr.msk.bf16.mxu1 %vm669_vm14, %v946_v34  ;;  %vm264_vm14 = vcmp.eq.s32.totalorder %v228_v52, %v1131_v29 }
  0x86   : > { %vm675_vm0 = vmpackc.low %vm264_vm14, %vm263_vm13 }
  0x88   : > { %689 = vmatpush3.bf16.msk.msra.mxu0 %vm653_vm3, %v946_v34  ;;  %732 = vmatpush3.bf16.msk.msra.mxu1 %vm653_vm3, %v946_v34  ;;  %vm659_vm3 = vmpackc.low %vm248_vm2, %vm247_vm1 }
  0x89   : > { %690 = vmatprep.subr.msk.bf16.mxu0 %vm671_vm4, %v946_v34  ;;  %725 = vmatprep.subr.msk.bf16.mxu1 %vm671_vm4, %v946_v34 }
  0x8c   : > { %691 = vmatpush3.bf16.msk.msra.mxu0 %vm655_vm9, %v946_v34  ;;  %733 = vmatpush3.bf16.msk.msra.mxu1 %vm655_vm9, %v946_v34 }
  0x8d   : > { %692 = vmatprep.subr.msk.bf16.mxu0 %vm673_vm10, %v946_v34  ;;  %726 = vmatprep.subr.msk.bf16.mxu1 %vm673_vm10, %v946_v34 }
  0x90   : > { %693 = vmatpush3.bf16.msk.msra.mxu0 %vm657_vm15, %v946_v34  ;;  %734 = vmatpush3.bf16.msk.msra.mxu1 %vm657_vm15, %v946_v34 }
  0x91   : > { %694 = vmatprep.subr.msk.bf16.mxu0 %vm675_vm0, %v946_v34  ;;  %727 = vmatprep.subr.msk.bf16.mxu1 %vm675_vm0, %v946_v34 }
  0x94   : > { %695 = vmatpush3.bf16.msk.msra.mxu0 %vm659_vm3, %v946_v34  ;;  %735 = vmatpush3.bf16.msk.msra.mxu1 %vm659_vm3, %v946_v34 }
  0x97   : > { %426 = vmatmul.mubr.bf16.vlgmr.msra.gmra.mrb[0].mxu0 %v798_v55  ;;  %442 = vmatmul.mubr.bf16.vlgmr.msra.gmra.mrb[0].mxu1 %v801_v56 }
  0x98   : > { %433 = vmatprep.mubr.bf16.mxu0 %v804_v57  ;;  %449 = vmatprep.mubr.bf16.mxu1 %v806_v58 }
  0x9f   : > { %434 = vmatmul.mubr.bf16.gmra.mrb[4].mxu0 %v808_v59  ;;  %450 = vmatmul.mubr.bf16.gmra.mrb[4].mxu1 %v809_v60 }
 0x16a   : > { %v696_v61 = vpop.f32.mrb[0].mxu0  ;;  %v708_v62 = vpop.f32.mrb[0].mxu1 }
 0x16b   : > { %v697_v63 = vpop.f32.mrb[1].mxu0  ;;  %v709_v1 = vpop.f32.mrb[1].mxu1 }
 0x16c   : > { %v698_v2 = vadd.f32 %v697_v63, %v696_v61  ;;  %v710_v3 = vadd.f32 %v709_v1, %v708_v62  ;;  %v699_v5 = vpop.f32.mrb[2].mxu0  ;;  %v711_v7 = vpop.f32.mrb[2].mxu1 }
 0x16d   : > { %v700_v8 = vpop.f32.mrb[3].mxu0  ;;  %v712_v9 = vpop.f32.mrb[3].mxu1 }
 0x16e   : > { %v458_v10 = vadd.f32 %v710_v3, %v698_v2  ;;  %v701_v11 = vadd.f32 %v700_v8, %v699_v5  ;;  %v713_v12 = vadd.f32 %v712_v9, %v711_v7 }
 0x170   : > { %v459_v13 = vadd.f32 %v713_v12, %v701_v11 }
 0x172   : > { %v702_v14 = vpop.f32.mrb[4].mxu0  ;;  %v714_v16 = vpop.f32.mrb[4].mxu1 }
 0x173   : > { %v703_v19 = vpop.f32.mrb[5].mxu0  ;;  %v715_v21 = vpop.f32.mrb[5].mxu1 }
 0x174   : > { %v704_v22 = vadd.f32 %v703_v19, %v702_v14  ;;  %v716_v23 = vadd.f32 %v715_v21, %v714_v16  ;;  %v705_v24 = vpop.f32.mrb[6].mxu0  ;;  %v717_v25 = vpop.f32.mrb[6].mxu1 }
 0x175   : > { %v706_v26 = vpop.f32.mrb[7].mxu0  ;;  %v718_v27 = vpop.f32.mrb[7].mxu1 }
 0x176   : > { %v460_v28 = vadd.f32 %v716_v23, %v704_v22  ;;  %v707_v29 = vadd.f32 %v706_v26, %v705_v24  ;;  %v719_v30 = vadd.f32 %v718_v27, %v717_v25 }
 0x178   : > { %v461_v32 = vadd.f32 %v719_v30, %v707_v29 }
 0x17a   : > { %v466_v33 = vmul.f32 %v465_v31, %v461_v32 }
 0x17c   : > { %v467_v34 = vadd.f32 %v466_v33, %v460_v28 }
 0x17e   : > { %v468_v35 = vmul.f32 %v467_v34, %v465_v31 }
 0x180   : > { %v469_v36 = vadd.f32 %v468_v35, %v459_v13 }
 0x182   : > { %v470_v4 = vmul.f32 %v469_v36, %v465_v31 }
 0x184   : > { %v471_v37 = vadd.f32 %v470_v4, %v458_v10 }
 0x186   : > { %v476_v38 = vmul.f32 %v475_v6, %v471_v37  ;;  %v478_v39 = vrot.slane %v471_v37, 6  ;;  %v482_v42 = vrot.slane %v471_v37, 4  ;;  %v486_v45 = vrot.slane %v471_v37, 2 }
 0x188   : > { %v480_v40 = vadd.f32 %v478_v39, %v476_v38 }
 0x18a   : > { %v481_v41 = vmul.f32 %v480_v40, %v475_v6 }
 0x18c   : > { %v484_v43 = vadd.f32 %v482_v42, %v481_v41 }
 0x18e   : > { %v485_v44 = vmul.f32 %v484_v43, %v475_v6 }
 0x190   : > { %v488_v47 = vadd.f32 %v486_v45, %v485_v44 }
 0x192   : > { %v492_v48 = vsub.f32 %v488_v47, %v490_v46 }
 0x194   : > { %v493_v49 = vmul.f32 10.0, %v492_v48 }
 0x196   : > { %v494_v50 = vmul.f32 %v493_v49, %v493_v49 }
 0x198   : > { %v496_v15 = vrot.slane %v494_v50, 1 }
 0x19a   : > { %v498_v20 = vadd.f32 %v496_v15, %v494_v50 }
 0x19c   : > { %v499_v51 = vmul.f32 -0.5, %v498_v20 }
 0x19e   : > { %v500_v52 = vmul.f32 1.442695, %v499_v51 }
 0x1a0   : > { %810 = vpow2.f32 %v500_v52 }
 0x1aa   : > { %v811_v53 = vpop.eup %810 }
 0x1ab   : > { %v502_v54 = vmul.f32 1.5915494, %v811_v53 }
 0x1ad   : > { %503 = vst [vmem:[%s172_s17 - $0x6] sm:$0x40] %v502_v54 }
 0x1ae   : > { %883 = shalt.err (!%p880_p7)
}
 0x1af   : > { %s884_s6 = scalar_lea.hbm %s1236_s29, 16  ;;  %s888_s24 = scalar_lea.hbm %s1282_s2, 32 }
 0x1b0   : > { %p885_p9 = scmp.ne.s32.totalorder %s1236_s29, %s884_s6  ;;  %p889_p0 = scmp.lt.u32.totalorder %s1236_s29, %s1282_s2 }
 0x1b1   : > { %p890_p1 = scmp.lt.u32.totalorder %s888_s24, %s884_s6  ;;  %p892_p11 = scmp.lt.u32.totalorder %s884_s6, %s1236_s29 }
 0x1b2   : > { %p886_p2 = pnand %p885_p9, %p1054_p12 }
 0x1b3   : > { %p891_p4 = por %p890_p1, %p889_p0 }
 0x1b4   : > { %p887_p5 = pneg %p886_p2 }
 0x1b5   : > { %p893_p6 = por %p892_p11, %p891_p4 }
 0x1b7   : > { %p894_p8 = pnand %p893_p6, %p887_p5 }
 0x1b9   : > { %897 = shalt.err (!%p894_p8)
}
 0x1ba   : > { %744 = dma.vmem_to_hbm [thread:$0]  (%p1054_p12), %s1238_s27, 16, %s1236_s29, %s505_s30  }
 0x1bb PF: > { %s529_s26 = sand.u32 1, %s928_s9   ;;  %p1297_p10 = scmp.ne.s32.totalorder %s1287_s16, 0 }
 0x1bc   : > { %p1298_p13 = scmp.ge.s32.totalorder %s940_s12, 2  ;;  %s530_s19 = scalar_lea.sflag [#allocation4], %s529_s26 }
 0x1be   : > { %p755_p3 = pnand %p1298_p13, %p1297_p10 }
 0x1c0   : > { %923 = dma.done.wait (!%p755_p3), %s530_s19, 16  }
 0x1c1   : > { %925 = vsyncadd (!%p755_p3), %s530_s19, 4294967280  ;;  %p16_p7 = scmp.ge.s32.totalorder %s1019_s21, 4   ;;  %s1299_s9 = smov %s932_s10 }
 0x1c2   : > { %s1300_s10 = smov %s936_s11  ;;  %s1301_s11 = smov %s1050_s8 }
 0x1c3   : > { %s1302_s12 = smov %s1019_s21  ;;  %18 = sbr.rel (!%p16_p7) target bundleno = 6 (0x6), region = 78 }
 0x1ca   :  { %534 = vsyncpa [#allocation3], 1 }
 0x1cb   :  { %536 = vsyncpa [#allocation3 + $0x1], 1 }
 0x1cc   :  { %537 = vsyncpa [#allocation6], 1 }
 0x1cd   :  { %539 = vsyncpa [#allocation6 + $0x1], 1 }
 0x1ce   :  { %540 = vsyncpa [#allocation4], 1 }
 0x1cf   :  { %542 = vsyncpa [#allocation4 + $0x1], 1 }

// kernel: tpu_custom_call.1
= control target key start
LH: loop header
LB: loop body
LE: loop exit
PB: predicated region body
PF: predicated region fallthrough
CT: control target
= control target key end

     0   :  { %7 = vsyncpa [#allocation3], 0  ;;  %s1280_s0 = inlined_call_operand.hbm [shape: bf16[64,256], index: 0, kind: input, shape index: {}]   ;;  %s1281_s1 = inlined_call_operand.hbm [shape: f32[4,256], index: 1, kind: input, shape index: {}]   ;;  %s1282_s2 = inlined_call_operand.hbm [shape: f32[1,256], index: 2, kind: output, shape index: {}]  }
   0x1   :  { %8 = vsyncpa [#allocation6], 0 }
   0x2   :  { %10 = vsyncpa [#allocation6 + $0x1], 0 }
   0x3   :  { %11 = vsyncpa [#allocation4], 0 }
   0x4   :  { %13 = vsyncpa [#allocation4 + $0x1], 0  ;;  %s963_s9 = smov 0   ;;  %s965_s10 = smov 0  }
   0x5   :  { %s967_s11 = smov 0   ;;  %s969_s12 = smov 0  }
   0x6 LB: > { %s984_s13 = sadd.s32 4294967295, %s940_s12   ;;  %s595_s14 = sadd.s32 4294967294, %s940_s12   ;;  %s940_s12 = sphi %s969_s12, %s1302_s12   ;;  %s936_s11 = sphi %s967_s11, %s1301_s11   ;;  %s932_s10 = sphi %s965_s10, %s1300_s10   ;;  %s928_s9 = sphi %s963_s9, %s1299_s9  }
   0x7   : > { %p60_p0 = scmp.ne.s32.totalorder %s932_s10, %s928_s9  ;;  %p1283_p1 = scmp.eq.s32.totalorder %s984_s13, 0 }
   0x8   : > { %p90_p3 = scmp.eq.s32.totalorder %s595_s14, 1  ;;  %p596_p5 = scmp.ge.s32.totalorder %s940_s12, 1 }
   0x9   : > { %p993_p4 = por %p1283_p1, %p60_p0  ;;  %p97_p7 = scmp.lt.s32.totalorder %s940_s12, 3 }
   0xa   : > { %p998_p6 = por %p90_p3, %p60_p0  ;;  %s942_s18 = smov [#allocation2]  }
   0xb   : > { %s1286_s15 = scalar_select %p993_p4, 1, 0 }
   0xc   : > { %s1287_s16 = scalar_select %p998_p6, 1, 0 }
   0xd   : > { %p1003_p8 = pnand %p596_p5, %p97_p7  ;;  %s109_s19 = sshll.u32 %s942_s18, 4  ;;  %s1007_s19 = int_to_ptr.vmem [resolvable:$true] %s109_s19 }
   0xe   : > { %s1019_s21 = sadd.s32 1, %s940_s12   ;;  %s47_s22 = sadd.s32 1, %s936_s11 }
   0xf   : > { %s1288_s17 = scalar_select %p1003_p8, 1, 0 }
  0x10   : > { %p746_p9 = pneg %p1003_p8  ;;  %s44_s23 = ssub.s32 %s940_s12, %s1019_s21 }
  0x11   : > { %s812_s26 = scalar_lea.hbm %s1280_s0, 1024 }
  0x12   : > { %p1014_p11 = pnand %p746_p9, %p1283_p1  ;;  %p813_p12 = scmp.ne.s32.totalorder %s1280_s0, %s812_s26 }
  0x13   : > { %p819_p5 = scmp.lt.u32.totalorder %s812_s26, %s1280_s0 }
  0x14   : > { %p814_p13 = pneg %p1014_p11 }
  0x16   : > { %p815_p0 = pnand %p814_p13, %p813_p12 }
  0x18   : > { %p816_p3 = pneg %p815_p0 }
  0x1a   : > { %p821_p7 = pnand %p819_p5, %p816_p3 }
  0x1c   : > { %824 = shalt.err (!%p821_p7)
}
  0x1d   : > { %s825_s3 = scalar_lea.vmem %s1007_s19, 1024  ;;  %p833_p2 = scmp.lt.s32.totalorder %s1007_s19, %s1007_s19 }
  0x1e   : > { %p826_p9 = scmp.ne.s32.totalorder %s1007_s19, %s825_s3  ;;  %p834_p6 = scmp.lt.s32.totalorder %s825_s3, %s825_s3 }
  0x20   : > { %p828_p10 = pnand %p826_p9, %p814_p13  ;;  %p835_p4 = por %p834_p6, %p833_p2 }
  0x22   : > { %p829_p1 = pneg %p828_p10 }
  0x24   : > { %p836_p8 = pnand %p835_p4, %p829_p1 }
  0x26   : > { %839 = shalt.err (!%p836_p8)
}
  0x27   : > { %s943_s4 = smov 128   ;;  %s944_s5 = smov 8  }
  0x28   : > { %749 = dma.hbm_to_vmem [thread:$0]  (!%p1014_p11), %s1280_s0, 1024, %s1007_s19, [#allocation3], %s943_s4, %s943_s4, %s944_s5  }
  0x29   : > { %p45_p2 = scmp.eq.s32.totalorder %s44_s23, 0  ;;  %p54_p1 = scmp.ne.s32.totalorder %s936_s11, %s932_s10 }
  0x2a   : > { %p55_p4 = scmp.eq.s32.totalorder %s940_s12, 0  ;;  %p759_p6 = scmp.lt.s32.totalorder %s940_s12, 2 }
  0x2b   : > { %s1050_s8 = scalar_select %p45_p2, %s936_s11, %s47_s22  }
  0x2c   : > { %p56_p8 = por %p55_p4, %p54_p1  ;;  %p1290_p10 = scmp.eq.s32.totalorder %s984_s13, 1 }
  0x2d   : > { %s123_s18 = sand.u32 1, %s936_s11   ;;  %s600_s24 = sshll.u32 %s940_s12, 6 }
  0x2e   : > { %p1054_p12 = por %p1290_p10, %p54_p1  ;;  %s599_s25 = sshll.u32 %s123_s18, 2 }
  0x2f   : > { %s1063_s27 = scalar_lea.hbm %s1281_s1, %s600_s24  ;;  %s127_s19 = scalar_lea.vmem [#allocation5], %s599_s25 }
  0x30   : > { %s134_s22 = sshll.u32 %s127_s19, 4  ;;  %p1065_p11 = pnand %p759_p6, %p56_p8  ;;  %s1069_s22 = int_to_ptr.vmem [resolvable:$true] %s134_s22 }
  0x31   : > { %s124_s28 = scalar_lea.sflag [#allocation6], %s123_s18  ;;  %s840_s29 = scalar_lea.hbm %s1063_s27, 64 }
  0x32   : > { %p841_p13 = scmp.ne.s32.totalorder %s1063_s27, %s840_s29  ;;  %p842_p0 = pneg %p1065_p11 }
  0x33   : > { %s845_s4 = scalar_lea.hbm %s1281_s1, 128  ;;  %p846_p7 = scmp.lt.u32.totalorder %s1063_s27, %s1281_s1 }
  0x34   : > { %p843_p3 = pnand %p842_p0, %p841_p13  ;;  %p847_p9 = scmp.lt.u32.totalorder %s845_s4, %s840_s29 }
  0x35   : > { %p849_p1 = scmp.lt.u32.totalorder %s840_s29, %s1063_s27 }
  0x36   : > { %p844_p5 = pneg %p843_p3  ;;  %p848_p2 = por %p847_p9, %p846_p7 }
  0x38   : > { %p850_p4 = por %p849_p1, %p848_p2 }
  0x3a   : > { %p851_p6 = pnand %p850_p4, %p844_p5 }
  0x3c   : > { %854 = shalt.err (!%p851_p6)
}
  0x3d   : > { %s855_s7 = scalar_lea.vmem %s1069_s22, 64  ;;  %s945_s18 = smov [#allocation5]  }
  0x3e   : > { %p856_p8 = scmp.ne.s32.totalorder %s1069_s22, %s855_s7  ;;  %s860_s24 = sshll.u32 %s945_s18, 4  ;;  %s861_s24 = int_to_ptr.vmem [resolvable:$false] %s860_s24 }
  0x3f   : > { %s862_s25 = scalar_lea.vmem %s861_s24, 128  ;;  %p863_p3 = scmp.lt.s32.totalorder %s1069_s22, %s861_s24 }
  0x40   : > { %p858_p10 = pnand %p856_p8, %p842_p0  ;;  %p864_p7 = scmp.lt.s32.totalorder %s862_s25, %s855_s7 }
  0x42   : > { %p859_p13 = pneg %p858_p10  ;;  %p865_p9 = por %p864_p7, %p863_p3 }
  0x44   : > { %p866_p2 = pnand %p865_p9, %p859_p13 }
  0x46   : > { %869 = shalt.err (!%p866_p2)
}
  0x47   : > { %753 = dma.hbm_to_vmem [thread:$0]  (!%p1065_p11), %s1063_s27, 64, %s1069_s22, %s124_s28  }
  0x48   : > { %p1293_p5 = scmp.ne.s32.totalorder %s1288_s17, 0 }
  0x49   : > { %p1294_p0 = scmp.eq.s32.totalorder (!%p1293_p5), %s984_s13, 0 }
  0x4a   : > { %143 = sbr.rel (%p1293_p5) target bundleno = 443 (0x1bb), region = 28 }
  0x51   : > { %915 = dma.done.wait (%p1294_p0), [#allocation3], 1024   ;;  %p1295_p1 = pmov %p1294_p0 }
  0x52   : > { %s1103_s20 = sand.u32 1, %s932_s10   ;;  %p1296_p4 = scmp.ne.s32.totalorder %s1286_s15, 0 }
  0x53   : > { %917 = vsyncadd (%p1295_p1), [#allocation3], 4294966272  ;;  %s603_s26 = sshll.u32 %s1103_s20, 2  ;;  %s150_s19 = scalar_lea.sflag [#allocation6], %s1103_s20 }
  0x54   : > { %s153_s23 = scalar_lea.vmem [#allocation5], %s603_s26 }
  0x55   : > { %919 = dma.done.wait (%p1296_p4), %s150_s19, 64  }
  0x56   : > { %921 = vsyncadd (%p1296_p4), %s150_s19, 4294967232  ;;  %v1111_v0 = vld [vmem:[%s153_s23] sm:$0xf]  ;;  %v196_v12 = vlaneseq  ;;  %v946_v34 = vmov 1.0|1.0   ;;  %s677_s15 = sshll.u32 %s984_s13, 4 }
  0x57   : > { %v175_v1 = vmul.f32 0.5, %v1111_v0  ;;  %v800_v3 = vld [vmem:[#allocation2 + $0x4] ss:$8 sps:$4 sm:$0xff]   ;;  %v798_v55 = vld [vmem:[#allocation2] ss:$8 sps:$4 sm:$0xff]   ;;  %s172_s17 = scalar_lea.vmem [#allocation7], %s1103_s20  ;;  %s1236_s29 = scalar_lea.hbm %s1282_s2, %s677_s15 }
  0x58   : > { %425 = vmatprep.mubr.bf16.mxu0 %v800_v3  ;;  %v803_v5 = vld [vmem:[#allocation2 + $0x24] ss:$8 sps:$4 sm:$0xff]   ;;  %v1119_v15 = vshrl.u32 %v196_v12, 7  ;;  %v801_v56 = vld [vmem:[#allocation2 + $0x20] ss:$8 sps:$4 sm:$0xff]   ;;  %s517_s27 = sshll.u32 %s172_s17, 4  ;;  %s1238_s27 = int_to_ptr.vmem [resolvable:$true] %s517_s27 }
  0x59   : > { %v176_v2 = vadd.f32 0.5, %v175_v1  ;;  %441 = vmatprep.mubr.bf16.mxu1 %v803_v5  ;;  %v804_v57 = vld [vmem:[#allocation2 + $0x14] ss:$8 sps:$4 sm:$0xff]   ;;  %v808_v59 = vld [vmem:[#allocation2 + $0x10] ss:$8 sps:$4 sm:$0xff]   ;;  %s505_s30 = scalar_lea.sflag [#allocation4], %s1103_s20 }
  0x5a   : > { %v231_v20 = vsub.s32 1, %v1119_v15  ;;  %v213_v22 = vadd.s32 128, %v1119_v15  ;;  %v214_v23 = vadd.s32 136, %v1119_v15  ;;  %v198_v24 = vadd.s32 8, %v1119_v15  ;;  %v806_v58 = vld [vmem:[#allocation2 + $0x34] ss:$8 sps:$4 sm:$0xff]  }
  0x5b   : > { %v1114_v4 = vmul.f32 16.0, %v176_v2  ;;  %v215_v25 = vadd.s32 144, %v1119_v15  ;;  %v216_v26 = vadd.s32 152, %v1119_v15  ;;  %v199_v27 = vadd.s32 16, %v1119_v15  ;;  %v809_v60 = vld [vmem:[#allocation2 + $0x30] ss:$8 sps:$4 sm:$0xff]  }
  0x5c   : > { %v200_v28 = vadd.s32 24, %v1119_v15  ;;  %v217_v30 = vadd.s32 160, %v1119_v15  ;;  %v218_v31 = vadd.s32 168, %v1119_v15  ;;  %v201_v32 = vadd.s32 32, %v1119_v15  ;;  %s870_s3 = scalar_lea.vmem %s1238_s27, 16  ;;  %s947_s13 = smov [#allocation7]  }
  0x5d   : > { %v178_v6 = vfloor.f32 %v1114_v4  ;;  %v202_v33 = vadd.s32 40, %v1119_v15  ;;  %v219_v35 = vadd.s32 176, %v1119_v15  ;;  %v220_v36 = vadd.s32 184, %v1119_v15  ;;  %p871_p11 = scmp.ne.s32.totalorder %s1238_s27, %s870_s3  ;;  %s874_s4 = sshll.u32 %s947_s13, 4  ;;  %s875_s4 = int_to_ptr.vmem [resolvable:$false] %s874_s4 }
  0x5e   : > { %v203_v37 = vadd.s32 48, %v1119_v15  ;;  %v204_v38 = vadd.s32 56, %v1119_v15  ;;  %v221_v39 = vadd.s32 192, %v1119_v15  ;;  %v222_v40 = vadd.s32 200, %v1119_v15  ;;  %s876_s5 = scalar_lea.vmem %s875_s4, 32  ;;  %p877_p10 = scmp.lt.s32.totalorder %s1238_s27, %s875_s4 }
  0x5f   : > { %v736_v7 = vtrunc.f32 %v178_v6  ;;  %v205_v41 = vadd.s32 64, %v1119_v15  ;;  %v206_v42 = vadd.s32 72, %v1119_v15  ;;  %v223_v43 = vadd.s32 208, %v1119_v15  ;;  %p872_p6 = pnand %p871_p11, %p1054_p12  ;;  %p878_p13 = scmp.lt.s32.totalorder %s876_s5, %s870_s3 }
  0x60   : > { %v224_v44 = vadd.s32 216, %v1119_v15  ;;  %v207_v45 = vadd.s32 80, %v1119_v15  ;;  %v208_v46 = vadd.s32 88, %v1119_v15  ;;  %v225_v47 = vadd.s32 224, %v1119_v15 }
  0x61   : > { %v737_v8 = vcvt.f32.s32 %v736_v7  ;;  %v226_v48 = vadd.s32 232, %v1119_v15  ;;  %v209_v49 = vadd.s32 96, %v1119_v15  ;;  %v210_v50 = vadd.s32 104, %v1119_v15  ;;  %p873_p8 = pneg %p872_p6  ;;  %p879_p3 = por %p878_p13, %p877_p10 }
  0x62   : > { %v227_v51 = vadd.s32 240, %v1119_v15  ;;  %v228_v52 = vadd.s32 248, %v1119_v15  ;;  %v211_v53 = vadd.s32 112, %v1119_v15  ;;  %v212_v54 = vadd.s32 120, %v1119_v15 }
  0x63   : > { %v182_v9 = vsub.s32 0, %v737_v8  ;;  %vm181_vm0 = vcmp.lt.s32.totalorder %v737_v8, 0  ;;  %p880_p7 = pnand %p879_p3, %p873_p8 }
  0x65   : > { %v604_v10 = vmin.u32 %v737_v8, %v182_v9 }
  0x67   : > { %v185_v11 = vand.u32 15, %v604_v10 }
  0x69   : > { %v186_v13 = vsub.s32 0, %v185_v11 }
  0x6b   : > { %v187_v14 = vsel %vm181_vm0, %v186_v13, %v185_v11 }
  0x6c   : > { %vm188_vm1 = vcmp.ne.s32.totalorder %v187_v14, 0  ;;  %vm189_vm2 = vcmp.lt.s32.totalorder %v187_v14, 0  ;;  %v191_v16 = vadd.s32 16, %v187_v14 }
  0x6d   : > { %vm190_vm3 = vmand %vm189_vm2, %vm188_vm1 }
  0x6e   : > { %v192_v17 = vsel %vm190_vm3, %v191_v16, %v187_v14 }
  0x6f   : > { %v193_v18 = vmul.u32 16, %v192_v17  ;;  %v194_v19 = vrot.slane %v192_v17, 7  ;;  %v179_v17 = vsub.f32 %v1114_v4, %v178_v6 }
  0x71   : > { %v195_v21 = vadd.s32 %v194_v19, %v193_v18  ;;  %v464_v18 = vsub.s32 0, %v1119_v15  ;;  %v475_v6 = vrot.slane %v179_v17, %v231_v20 }
  0x73   : > { %v1131_v29 = vrot.slane %v195_v21, %v231_v20 }
  0x75   : > { %vm249_vm4 = vcmp.eq.s32.totalorder %v213_v22, %v1131_v29  ;;  %vm250_vm5 = vcmp.eq.s32.totalorder %v214_v23, %v1131_v29  ;;  %vm233_vm6 = vcmp.eq.s32.totalorder %v1119_v15, %v1131_v29  ;;  %vm234_vm7 = vcmp.eq.s32.totalorder %v198_v24, %v1131_v29 }
  0x76   : > { %vm661_vm8 = vmpackc.low %vm250_vm5, %vm249_vm4  ;;  %vm251_vm9 = vcmp.eq.s32.totalorder %v215_v25, %v1131_v29  ;;  %vm252_vm10 = vcmp.eq.s32.totalorder %v216_v26, %v1131_v29  ;;  %vm235_vm11 = vcmp.eq.s32.totalorder %v199_v27, %v1131_v29  ;;  %vm236_vm12 = vcmp.eq.s32.totalorder %v200_v28, %v1131_v29 }
  0x77   : > { %680 = vmatprep.subr.msk.bf16.mxu0 %vm661_vm8, %v946_v34  ;;  %720 = vmatprep.subr.msk.bf16.mxu1 %vm661_vm8, %v946_v34  ;;  %vm645_vm13 = vmpackc.low %vm234_vm7, %vm233_vm6  ;;  %vm253_vm14 = vcmp.eq.s32.totalorder %v217_v30, %v1131_v29  ;;  %vm254_vm15 = vcmp.eq.s32.totalorder %v218_v31, %v1131_v29  ;;  %vm237_vm3 = vcmp.eq.s32.totalorder %v201_v32, %v1131_v29 }
  0x78   : > { %681 = vmatpush3.bf16.msk.msra.mxu0 %vm645_vm13, %v946_v34  ;;  %728 = vmatpush3.bf16.msk.msra.mxu1 %vm645_vm13, %v946_v34  ;;  %vm663_vm0 = vmpackc.low %vm252_vm10, %vm251_vm9  ;;  %vm238_vm4 = vcmp.eq.s32.totalorder %v202_v33, %v1131_v29  ;;  %vm255_vm5 = vcmp.eq.s32.totalorder %v219_v35, %v1131_v29  ;;  %vm256_vm6 = vcmp.eq.s32.totalorder %v220_v36, %v1131_v29 }
  0x79   : > { %682 = vmatprep.subr.msk.bf16.mxu0 %vm663_vm0, %v946_v34  ;;  %721 = vmatprep.subr.msk.bf16.mxu1 %vm663_vm0, %v946_v34  ;;  %vm647_vm1 = vmpackc.low %vm236_vm12, %vm235_vm11  ;;  %vm239_vm9 = vcmp.eq.s32.totalorder %v203_v37, %v1131_v29  ;;  %vm240_vm10 = vcmp.eq.s32.totalorder %v204_v38, %v1131_v29  ;;  %vm257_vm11 = vcmp.eq.s32.totalorder %v221_v39, %v1131_v29 }
  0x7a   : > { %vm665_vm2 = vmpackc.low %vm254_vm15, %vm253_vm14  ;;  %vm258_vm12 = vcmp.eq.s32.totalorder %v222_v40, %v1131_v29  ;;  %vm241_vm15 = vcmp.eq.s32.totalorder %v205_v41, %v1131_v29  ;;  %vm242_vm0 = vcmp.eq.s32.totalorder %v206_v42, %v1131_v29  ;;  %v465_v31 = vrot.slane %v179_v17, %v464_v18 }
  0x7b   : > { %vm649_vm7 = vmpackc.low %vm238_vm4, %vm237_vm3 }
  0x7c   : > { %683 = vmatpush3.bf16.msk.msra.mxu0 %vm647_vm1, %v946_v34  ;;  %729 = vmatpush3.bf16.msk.msra.mxu1 %vm647_vm1, %v946_v34  ;;  %vm667_vm8 = vmpackc.low %vm256_vm6, %vm255_vm5  ;;  %vm259_vm1 = vcmp.eq.s32.totalorder %v223_v43, %v1131_v29  ;;  %vm243_vm5 = vcmp.eq.s32.totalorder %v207_v45, %v1131_v29  ;;  %vm244_vm6 = vcmp.eq.s32.totalorder %v208_v46, %v1131_v29  ;;  %v490_v46 = vrot.slane %v1111_v0, 4 }
  0x7d   : > { %684 = vmatprep.subr.msk.bf16.mxu0 %vm665_vm2, %v946_v34  ;;  %722 = vmatprep.subr.msk.bf16.mxu1 %vm665_vm2, %v946_v34  ;;  %vm651_vm13 = vmpackc.low %vm240_vm10, %vm239_vm9  ;;  %vm260_vm2 = vcmp.eq.s32.totalorder %v224_v44, %v1131_v29 }
  0x7e   : > { %vm669_vm14 = vmpackc.low %vm258_vm12, %vm257_vm11  ;;  %vm245_vm11 = vcmp.eq.s32.totalorder %v209_v49, %v1131_v29  ;;  %vm246_vm12 = vcmp.eq.s32.totalorder %v210_v50, %v1131_v29 }
  0x7f   : > { %vm653_vm3 = vmpackc.low %vm242_vm0, %vm241_vm15 }
  0x80   : > { %685 = vmatpush3.bf16.msk.msra.mxu0 %vm649_vm7, %v946_v34  ;;  %730 = vmatpush3.bf16.msk.msra.mxu1 %vm649_vm7, %v946_v34  ;;  %vm671_vm4 = vmpackc.low %vm260_vm2, %vm259_vm1  ;;  %vm261_vm7 = vcmp.eq.s32.totalorder %v225_v47, %v1131_v29  ;;  %vm247_vm1 = vcmp.eq.s32.totalorder %v211_v53, %v1131_v29  ;;  %vm248_vm2 = vcmp.eq.s32.totalorder %v212_v54, %v1131_v29 }
  0x81   : > { %686 = vmatprep.subr.msk.bf16.mxu0 %vm667_vm8, %v946_v34  ;;  %723 = vmatprep.subr.msk.bf16.mxu1 %vm667_vm8, %v946_v34  ;;  %vm262_vm8 = vcmp.eq.s32.totalorder %v226_v48, %v1131_v29  ;;  %vm655_vm9 = vmpackc.low %vm244_vm6, %vm243_vm5 }
  0x82   : > { %vm673_vm10 = vmpackc.low %vm262_vm8, %vm261_vm7 }
  0x83   : > { %vm657_vm15 = vmpackc.low %vm246_vm12, %vm245_vm11 }
  0x84   : > { %687 = vmatpush3.bf16.msk.msra.mxu0 %vm651_vm13, %v946_v34  ;;  %731 = vmatpush3.bf16.msk.msra.mxu1 %vm651_vm13, %v946_v34  ;;  %vm263_vm13 = vcmp.eq.s32.totalorder %v227_v51, %v1131_v29 }
  0x85   : > { %688 = vmatprep.subr.msk.bf16.mxu0 %vm669_vm14, %v946_v34  ;;  %724 = vmatprep.subr.msk.bf16.mxu1 %vm669_vm14, %v946_v34  ;;  %vm264_vm14 = vcmp.eq.s32.totalorder %v228_v52, %v1131_v29 }
  0x86   : > { %vm675_vm0 = vmpackc.low %vm264_vm14, %vm263_vm13 }
  0x88   : > { %689 = vmatpush3.bf16.msk.msra.mxu0 %vm653_vm3, %v946_v34  ;;  %732 = vmatpush3.bf16.msk.msra.mxu1 %vm653_vm3, %v946_v34  ;;  %vm659_vm3 = vmpackc.low %vm248_vm2, %vm247_vm1 }
  0x89   : > { %690 = vmatprep.subr.msk.bf16.mxu0 %vm671_vm4, %v946_v34  ;;  %725 = vmatprep.subr.msk.bf16.mxu1 %vm671_vm4, %v946_v34 }
  0x8c   : > { %691 = vmatpush3.bf16.msk.msra.mxu0 %vm655_vm9, %v946_v34  ;;  %733 = vmatpush3.bf16.msk.msra.mxu1 %vm655_vm9, %v946_v34 }
  0x8d   : > { %692 = vmatprep.subr.msk.bf16.mxu0 %vm673_vm10, %v946_v34  ;;  %726 = vmatprep.subr.msk.bf16.mxu1 %vm673_vm10, %v946_v34 }
  0x90   : > { %693 = vmatpush3.bf16.msk.msra.mxu0 %vm657_vm15, %v946_v34  ;;  %734 = vmatpush3.bf16.msk.msra.mxu1 %vm657_vm15, %v946_v34 }
  0x91   : > { %694 = vmatprep.subr.msk.bf16.mxu0 %vm675_vm0, %v946_v34  ;;  %727 = vmatprep.subr.msk.bf16.mxu1 %vm675_vm0, %v946_v34 }
  0x94   : > { %695 = vmatpush3.bf16.msk.msra.mxu0 %vm659_vm3, %v946_v34  ;;  %735 = vmatpush3.bf16.msk.msra.mxu1 %vm659_vm3, %v946_v34 }
  0x97   : > { %426 = vmatmul.mubr.bf16.vlgmr.msra.gmra.mrb[0].mxu0 %v798_v55  ;;  %442 = vmatmul.mubr.bf16.vlgmr.msra.gmra.mrb[0].mxu1 %v801_v56 }
  0x98   : > { %433 = vmatprep.mubr.bf16.mxu0 %v804_v57  ;;  %449 = vmatprep.mubr.bf16.mxu1 %v806_v58 }
  0x9f   : > { %434 = vmatmul.mubr.bf16.gmra.mrb[4].mxu0 %v808_v59  ;;  %450 = vmatmul.mubr.bf16.gmra.mrb[4].mxu1 %v809_v60 }
 0x16a   : > { %v696_v61 = vpop.f32.mrb[0].mxu0  ;;  %v708_v62 = vpop.f32.mrb[0].mxu1 }
 0x16b   : > { %v697_v63 = vpop.f32.mrb[1].mxu0  ;;  %v709_v1 = vpop.f32.mrb[1].mxu1 }
 0x16c   : > { %v698_v2 = vadd.f32 %v697_v63, %v696_v61  ;;  %v710_v3 = vadd.f32 %v709_v1, %v708_v62  ;;  %v699_v5 = vpop.f32.mrb[2].mxu0  ;;  %v711_v7 = vpop.f32.mrb[2].mxu1 }
 0x16d   : > { %v700_v8 = vpop.f32.mrb[3].mxu0  ;;  %v712_v9 = vpop.f32.mrb[3].mxu1 }
 0x16e   : > { %v458_v10 = vadd.f32 %v710_v3, %v698_v2  ;;  %v701_v11 = vadd.f32 %v700_v8, %v699_v5  ;;  %v713_v12 = vadd.f32 %v712_v9, %v711_v7 }
 0x170   : > { %v459_v13 = vadd.f32 %v713_v12, %v701_v11 }
 0x172   : > { %v702_v14 = vpop.f32.mrb[4].mxu0  ;;  %v714_v16 = vpop.f32.mrb[4].mxu1 }
 0x173   : > { %v703_v19 = vpop.f32.mrb[5].mxu0  ;;  %v715_v21 = vpop.f32.mrb[5].mxu1 }
 0x174   : > { %v704_v22 = vadd.f32 %v703_v19, %v702_v14  ;;  %v716_v23 = vadd.f32 %v715_v21, %v714_v16  ;;  %v705_v24 = vpop.f32.mrb[6].mxu0  ;;  %v717_v25 = vpop.f32.mrb[6].mxu1 }
 0x175   : > { %v706_v26 = vpop.f32.mrb[7].mxu0  ;;  %v718_v27 = vpop.f32.mrb[7].mxu1 }
 0x176   : > { %v460_v28 = vadd.f32 %v716_v23, %v704_v22  ;;  %v707_v29 = vadd.f32 %v706_v26, %v705_v24  ;;  %v719_v30 = vadd.f32 %v718_v27, %v717_v25 }
 0x178   : > { %v461_v32 = vadd.f32 %v719_v30, %v707_v29 }
 0x17a   : > { %v466_v33 = vmul.f32 %v465_v31, %v461_v32 }
 0x17c   : > { %v467_v34 = vadd.f32 %v466_v33, %v460_v28 }
 0x17e   : > { %v468_v35 = vmul.f32 %v467_v34, %v465_v31 }
 0x180   : > { %v469_v36 = vadd.f32 %v468_v35, %v459_v13 }
 0x182   : > { %v470_v4 = vmul.f32 %v469_v36, %v465_v31 }
 0x184   : > { %v471_v37 = vadd.f32 %v470_v4, %v458_v10 }
 0x186   : > { %v476_v38 = vmul.f32 %v475_v6, %v471_v37  ;;  %v478_v39 = vrot.slane %v471_v37, 6  ;;  %v482_v42 = vrot.slane %v471_v37, 4  ;;  %v486_v45 = vrot.slane %v471_v37, 2 }
 0x188   : > { %v480_v40 = vadd.f32 %v478_v39, %v476_v38 }
 0x18a   : > { %v481_v41 = vmul.f32 %v480_v40, %v475_v6 }
 0x18c   : > { %v484_v43 = vadd.f32 %v482_v42, %v481_v41 }
 0x18e   : > { %v485_v44 = vmul.f32 %v484_v43, %v475_v6 }
 0x190   : > { %v488_v47 = vadd.f32 %v486_v45, %v485_v44 }
 0x192   : > { %v492_v48 = vsub.f32 %v488_v47, %v490_v46 }
 0x194   : > { %v493_v49 = vmul.f32 10.0, %v492_v48 }
 0x196   : > { %v494_v50 = vmul.f32 %v493_v49, %v493_v49 }
 0x198   : > { %v496_v15 = vrot.slane %v494_v50, 1 }
 0x19a   : > { %v498_v20 = vadd.f32 %v496_v15, %v494_v50 }
 0x19c   : > { %v499_v51 = vmul.f32 -0.5, %v498_v20 }
 0x19e   : > { %v500_v52 = vmul.f32 1.442695, %v499_v51 }
 0x1a0   : > { %810 = vpow2.f32 %v500_v52 }
 0x1aa   : > { %v811_v53 = vpop.eup %810 }
 0x1ab   : > { %v502_v54 = vmul.f32 1.5915494, %v811_v53 }
 0x1ad   : > { %503 = vst [vmem:[%s172_s17 - $0x6] sm:$0x40] %v502_v54 }
 0x1ae   : > { %883 = shalt.err (!%p880_p7)
}
 0x1af   : > { %s884_s6 = scalar_lea.hbm %s1236_s29, 16  ;;  %s888_s24 = scalar_lea.hbm %s1282_s2, 32 }
 0x1b0   : > { %p885_p9 = scmp.ne.s32.totalorder %s1236_s29, %s884_s6  ;;  %p889_p0 = scmp.lt.u32.totalorder %s1236_s29, %s1282_s2 }
 0x1b1   : > { %p890_p1 = scmp.lt.u32.totalorder %s888_s24, %s884_s6  ;;  %p892_p11 = scmp.lt.u32.totalorder %s884_s6, %s1236_s29 }
 0x1b2   : > { %p886_p2 = pnand %p885_p9, %p1054_p12 }
 0x1b3   : > { %p891_p4 = por %p890_p1, %p889_p0 }
 0x1b4   : > { %p887_p5 = pneg %p886_p2 }
 0x1b5   : > { %p893_p6 = por %p892_p11, %p891_p4 }
 0x1b7   : > { %p894_p8 = pnand %p893_p6, %p887_p5 }
 0x1b9   : > { %897 = shalt.err (!%p894_p8)
}
 0x1ba   : > { %744 = dma.vmem_to_hbm [thread:$0]  (%p1054_p12), %s1238_s27, 16, %s1236_s29, %s505_s30  }
 0x1bb PF: > { %s529_s26 = sand.u32 1, %s928_s9   ;;  %p1297_p10 = scmp.ne.s32.totalorder %s1287_s16, 0 }
 0x1bc   : > { %p1298_p13 = scmp.ge.s32.totalorder %s940_s12, 2  ;;  %s530_s19 = scalar_lea.sflag [#allocation4], %s529_s26 }
 0x1be   : > { %p755_p3 = pnand %p1298_p13, %p1297_p10 }
 0x1c0   : > { %923 = dma.done.wait (!%p755_p3), %s530_s19, 16  }
 0x1c1   : > { %925 = vsyncadd (!%p755_p3), %s530_s19, 4294967280  ;;  %p16_p7 = scmp.ge.s32.totalorder %s1019_s21, 4   ;;  %s1299_s9 = smov %s932_s10 }
 0x1c2   : > { %s1300_s10 = smov %s936_s11  ;;  %s1301_s11 = smov %s1050_s8 }
 0x1c3   : > { %s1302_s12 = smov %s1019_s21  ;;  %18 = sbr.rel (!%p16_p7) target bundleno = 6 (0x6), region = 78 }
 0x1ca   :  { %534 = vsyncpa [#allocation3], 1 }
 0x1cb   :  { %536 = vsyncpa [#allocation3 + $0x1], 1 }
 0x1cc   :  { %537 = vsyncpa [#allocation6], 1 }
 0x1cd   :  { %539 = vsyncpa [#allocation6 + $0x1], 1 }
 0x1ce   :  { %540 = vsyncpa [#allocation4], 1 }
 0x1cf   :  { %542 = vsyncpa [#allocation4 + $0x1], 1 }

</bundles_post_ra>
